<compile_context>
chip_gen: v7x
topology: tpu7x:2x2x1
jax: 0.10.0
libtpu: 0.0.40
codegen_flags: <defaults>
</compile_context>

<pallas_src>
import jax
import jax.numpy as jnp
from jax.experimental import pallas as pl
from jax.experimental.pallas import tpu as pltpu

EPS = 1e-5
KH = KW = 3


def _conv_bn_relu_kernel(x_ref, w_ref, g_ref, b_ref, o_ref):
    """Single-step fused conv(as matmul) + BN(train stats) + ReLU.

    x_ref: (HW, 9*Cin)   bf16  im2col patches (first ReLU already applied)
    w_ref: (9*Cin, Cout) bf16  repacked conv weights
    g_ref: (1, Cout)     f32   batchnorm gamma
    b_ref: (1, Cout)     f32   batchnorm beta
    o_ref: (HW, Cout)    f32   output
    """
    # One MXU matmul over K = 9*Cin, f32 accumulation.
    acc = jnp.dot(x_ref[...], w_ref[...], preferred_element_type=jnp.float32)

    # One-pass batch statistics (biased variance, training-mode BN).
    # HW rows are exactly H*W (no sublane padding added by the wrapper), so
    # acc.shape[0] is the correct BN divisor.
    inv_n = 1.0 / float(acc.shape[0])
    s1 = jnp.sum(acc, axis=0, keepdims=True)              # (1, Cout)
    s2 = jnp.sum(acc * acc, axis=0, keepdims=True)        # (1, Cout)
    mean = s1 * inv_n
    var = s2 * inv_n - mean * mean
    inv_std = jax.lax.rsqrt(var + EPS)
    scale = inv_std * g_ref[...]                          # (1, Cout)
    shift = b_ref[...] - mean * scale                     # (1, Cout)

    # BN affine + final ReLU + single lane-dense store.
    o_ref[...] = jnp.maximum(acc * scale + shift, 0.0).astype(o_ref.dtype)


@jax.jit
def relu_conv_bn_relu(x_nchw, w_oihw, gamma, beta):
    """x_nchw: (1, Cin, H, W) f32; w_oihw: (Cout, Cin, 3, 3) f32."""
    N, Cin, H, W = x_nchw.shape
    assert N == 1, "module operates on batch size 1"
    Cout = w_oihw.shape[0]
    HW = H * W
    KC = KH * KW * Cin                                    # 9 * Cin

    # First ReLU + bf16 cast ONCE on the raw activations (ReLU commutes with
    # zero-padding; cast after ReLU).
    x_hwc = jnp.maximum(jnp.transpose(x_nchw[0], (1, 2, 0)), 0.0)
    x_hwc = x_hwc.astype(jnp.bfloat16)                    # (H, W, Cin)
    x_pad = jnp.pad(x_hwc, ((1, 1), (1, 1), (0, 0)))      # (H+2, W+2, Cin)

    # im2col to a single (HW, 9*Cin) slab; K laid out as [kh, kw, cin].
    patches = jnp.concatenate(
        [x_pad[kh:kh + H, kw:kw + W, :].reshape(HW, Cin)
         for kh in range(KH) for kw in range(KW)],
        axis=1)                                           # (HW, 9*Cin) bf16

    # OIHW -> (KH, KW, Cin, Cout) -> (9*Cin, Cout); matches patches' K layout.
    w_mat = jnp.transpose(w_oihw, (2, 3, 1, 0)).reshape(
        KC, Cout).astype(jnp.bfloat16)                    # (9*Cin, Cout)

    g2 = gamma.reshape(1, Cout).astype(jnp.float32)
    b2 = beta.reshape(1, Cout).astype(jnp.float32)

    cost = pl.CostEstimate(
        flops=2 * HW * KC * Cout,
        transcendentals=Cout,
        bytes_accessed=(HW * KC * 2 + KC * Cout * 2
                        + 2 * Cout * 4 + HW * Cout * 4))

    out_flat = pl.pallas_call(
        _conv_bn_relu_kernel,
        out_shape=jax.ShapeDtypeStruct((HW, Cout), jnp.float32),
        grid_spec=pltpu.PrefetchScalarGridSpec(
            num_scalar_prefetch=0,
            grid=(1,),
            in_specs=[
                pl.BlockSpec((HW, KC), lambda i: (0, 0)),   # im2col slab
                pl.BlockSpec((KC, Cout), lambda i: (0, 0)),  # weights
                pl.BlockSpec((1, Cout), lambda i: (0, 0)),   # gamma
                pl.BlockSpec((1, Cout), lambda i: (0, 0)),   # beta
            ],
            out_specs=pl.BlockSpec((HW, Cout), lambda i: (0, 0)),
        ),
        compiler_params=pltpu.CompilerParams(
            dimension_semantics=("arbitrary",)),
        cost_estimate=cost,
    )(patches, w_mat, g2, b2)

    # (H*W, Cout) -> (H, W, Cout) -> (1, Cout, H, W)
    return jnp.transpose(out_flat.reshape(H, W, Cout), (2, 0, 1))[None, ...]


def _reference(x_nchw, w_oihw, gamma, beta):
    """Pure-JAX f32 reference of the module's forward."""
    xr = jnp.maximum(x_nchw, 0.0)
    conv = jax.lax.conv_general_dilated(
        xr, w_oihw, window_strides=(1, 1), padding=((1, 1), (1, 1)),
        dimension_numbers=("NCHW", "OIHW", "NCHW"))
    mean = conv.mean(axis=(0, 2, 3), keepdims=True)
    var = ((conv - mean) ** 2).mean(axis=(0, 2, 3), keepdims=True)
    y = (conv - mean) * jax.lax.rsqrt(var + EPS)
    y = y * gamma.reshape(1, -1, 1, 1) + beta.reshape(1, -1, 1, 1)
    return jnp.maximum(y, 0.0)


if __name__ == "__main__":
    key = jax.random.PRNGKey(0)
    k_x, k_w = jax.random.split(key)

    # Shapes implied by the module: (1, 256, 14, 14), Conv2d(256 -> 256, 3x3).
    N, C, H, W = 1, 256, 14, 14
    x = jax.random.normal(k_x, (N, C, H, W), dtype=jnp.float32)

    # Deterministic params (BatchNorm2d init: gamma=1, beta=0; conv has no bias).
    w = jax.random.normal(k_w, (C, C, KH, KW), dtype=jnp.float32) * 0.05
    gamma = jnp.ones((C,), jnp.float32)
    beta = jnp.zeros((C,), jnp.float32)

    out = jax.block_until_ready(relu_conv_bn_relu(x, w, gamma, beta))
    ref = jax.block_until_ready(_reference(x, w, gamma, beta))

    assert out.shape == (N, C, H, W)
    # Tolerance relaxed vs pure-f32: matmul operands are bf16 (f32 accumulation).
    max_err = jnp.max(jnp.abs(out - ref))
    assert jnp.allclose(out, ref, atol=5e-2, rtol=5e-2), (
        f"mismatch vs reference; max abs err = {max_err}")

    print("KERNEL_OK")
</pallas_src>

<mosaic_0001>
module attributes {stable_mosaic.version = 11 : i64} {
  func.func @_conv_bn_relu_kernel(%arg0: i32, %arg1: memref<196x2304xbf16, #tpu.memory_space<vmem>>, %arg2: memref<2304x256xbf16, #tpu.memory_space<vmem>>, %arg3: memref<1x256xf32, #tpu.memory_space<vmem>>, %arg4: memref<1x256xf32, #tpu.memory_space<vmem>>, %arg5: memref<196x256xf32, #tpu.memory_space<vmem>>) attributes {dimension_semantics = [#tpu.dimension_semantics<arbitrary>], iteration_bounds = array<i64: 1>, scalar_prefetch = 0 : i64, scratch_operands = 0 : i64, tpu.core_type = #tpu.core_type<tc>, window_params = [{pipeline_mode = #tpu.pipeline_mode<synchronous>, transform_indices = @transform_0, window_bounds = array<i64: 196, 2304>}, {pipeline_mode = #tpu.pipeline_mode<synchronous>, transform_indices = @transform_1, window_bounds = array<i64: 2304, 256>}, {pipeline_mode = #tpu.pipeline_mode<synchronous>, transform_indices = @transform_2, window_bounds = array<i64: 1, 256>}, {pipeline_mode = #tpu.pipeline_mode<synchronous>, transform_indices = @transform_3, window_bounds = array<i64: 1, 256>}, {pipeline_mode = #tpu.pipeline_mode<synchronous>, transform_indices = @transform_4, window_bounds = array<i64: 196, 256>}]} {
    %c0 = arith.constant 0 : index
    %c0_0 = arith.constant 0 : index
    %0 = vector.load %arg1[%c0, %c0_0] : memref<196x2304xbf16, #tpu.memory_space<vmem>>, vector<196x2304xbf16>
    %c0_1 = arith.constant 0 : index
    %c0_2 = arith.constant 0 : index
    %1 = vector.load %arg2[%c0_1, %c0_2] : memref<2304x256xbf16, #tpu.memory_space<vmem>>, vector<2304x256xbf16>
    %cst = arith.constant dense<0.000000e+00> : vector<196x256xf32>
    %2 = tpu.matmul %0, %1, %cst {dimension_numbers = #tpu.dot_dimension_numbers<[1], [0], [0], [1], [0, 0, 1, 1], [], []>} : vector<196x2304xbf16>, vector<2304x256xbf16>, vector<196x256xf32> -> vector<196x256xf32>
    %cst_3 = arith.constant dense<0.000000e+00> : vector<256xf32>
    %3 = vector.multi_reduction <add>, %2, %cst_3 [0] : vector<196x256xf32> to vector<256xf32>
    %4 = vector.shape_cast %3 : vector<256xf32> to vector<1x256xf32>
    %5 = arith.mulf %2, %2 : vector<196x256xf32>
    %cst_4 = arith.constant dense<0.000000e+00> : vector<256xf32>
    %6 = vector.multi_reduction <add>, %5, %cst_4 [0] : vector<196x256xf32> to vector<256xf32>
    %7 = vector.shape_cast %6 : vector<256xf32> to vector<1x256xf32>
    %cst_5 = arith.constant 0.00510204071 : f32
    %8 = vector.broadcast %cst_5 : f32 to vector<1x256xf32>
    %9 = arith.mulf %4, %8 : vector<1x256xf32>
    %cst_6 = arith.constant 0.00510204071 : f32
    %10 = vector.broadcast %cst_6 : f32 to vector<1x256xf32>
    %11 = arith.mulf %7, %10 : vector<1x256xf32>
    %12 = arith.mulf %9, %9 : vector<1x256xf32>
    %13 = arith.subf %11, %12 : vector<1x256xf32>
    %cst_7 = arith.constant 9.99999974E-6 : f32
    %14 = vector.broadcast %cst_7 : f32 to vector<1x256xf32>
    %15 = arith.addf %13, %14 : vector<1x256xf32>
    %16 = math.rsqrt %15 : vector<1x256xf32>
    %c0_8 = arith.constant 0 : index
    %c0_9 = arith.constant 0 : index
    %17 = vector.load %arg3[%c0_8, %c0_9] : memref<1x256xf32, #tpu.memory_space<vmem>>, vector<1x256xf32>
    %18 = arith.mulf %16, %17 : vector<1x256xf32>
    %c0_10 = arith.constant 0 : index
    %c0_11 = arith.constant 0 : index
    %19 = vector.load %arg4[%c0_10, %c0_11] : memref<1x256xf32, #tpu.memory_space<vmem>>, vector<1x256xf32>
    %20 = arith.mulf %9, %18 : vector<1x256xf32>
    %21 = arith.subf %19, %20 : vector<1x256xf32>
    %22 = vector.broadcast %18 : vector<1x256xf32> to vector<196x256xf32>
    %23 = arith.mulf %2, %22 : vector<196x256xf32>
    %24 = vector.broadcast %21 : vector<1x256xf32> to vector<196x256xf32>
    %25 = arith.addf %23, %24 : vector<196x256xf32>
    %cst_12 = arith.constant 0.000000e+00 : f32
    %26 = vector.broadcast %cst_12 : f32 to vector<196x256xf32>
    %27 = arith.maximumf %25, %26 : vector<196x256xf32>
    %c0_13 = arith.constant 0 : index
    %c0_14 = arith.constant 0 : index
    %28 = vector.load %arg5[%c0_13, %c0_14] : memref<196x256xf32, #tpu.memory_space<vmem>>, vector<196x256xf32>
    tpu.vector_store %arg5[%c0_13, %c0_14], %27 {strides = array<i32>} : memref<196x256xf32, #tpu.memory_space<vmem>>, vector<196x256xf32>,
    return
  }
  func.func @transform_0(%arg0: i32) -> (i32, i32) {
    %c0_i32 = arith.constant 0 : i32
    %c0_i32_0 = arith.constant 0 : i32
    %c0_i32_1 = arith.constant 0 : i32
    return %c0_i32, %c0_i32_0 : i32, i32
  }
  func.func @transform_1(%arg0: i32) -> (i32, i32) {
    %c0_i32 = arith.constant 0 : i32
    %c0_i32_0 = arith.constant 0 : i32
    %c0_i32_1 = arith.constant 0 : i32
    return %c0_i32, %c0_i32_0 : i32, i32
  }
  func.func @transform_2(%arg0: i32) -> (i32, i32) {
    %c0_i32 = arith.constant 0 : i32
    %c0_i32_0 = arith.constant 0 : i32
    %c0_i32_1 = arith.constant 0 : i32
    return %c0_i32, %c0_i32_0 : i32, i32
  }
  func.func @transform_3(%arg0: i32) -> (i32, i32) {
    %c0_i32 = arith.constant 0 : i32
    %c0_i32_0 = arith.constant 0 : i32
    %c0_i32_1 = arith.constant 0 : i32
    return %c0_i32, %c0_i32_0 : i32, i32
  }
  func.func @transform_4(%arg0: i32) -> (i32, i32) {
    %c0_i32 = arith.constant 0 : i32
    %c0_i32_0 = arith.constant 0 : i32
    %c0_i32_1 = arith.constant 0 : i32
    return %c0_i32, %c0_i32_0 : i32, i32
  }
}

</mosaic_0001>

<bundles_post_ra>
// kernel: relu_conv_bn_relu.1
= control target key start
LH: loop header
LB: loop body
LE: loop exit
PB: predicated region body
PF: predicated region fallthrough
CT: control target
= control target key end

     0   :  { %vm4585_vm0 = vcmask 1043456   ;;  %s9141_s1 = inlined_call_operand.vmem [shape: bf16[2304,256], index: 1, kind: input, shape index: {}]   ;;  %s9142_s0 = inlined_call_operand.vmem [shape: bf16[196,2304], index: 0, kind: input, shape index: {}]   ;;  %s9143_s2 = inlined_call_operand.vmem [shape: f32[1,256], index: 2, kind: input, shape index: {}]   ;;  %s9144_s3 = inlined_call_operand.vmem [shape: f32[1,256], index: 3, kind: input, shape index: {}]   ;;  %s9145_s4 = inlined_call_operand.vmem [shape: f32[196,256], index: 4, kind: output, shape index: {}]  }
   0x1   :  { %v5975_v0 = vld [vmem:[%s9141_s1 + $0x4] ss:$8 sps:$4 sm:$0xff]   ;;  %v5979_v2 = vld [vmem:[%s9141_s1] ss:$8 sps:$4 sm:$0xff]   ;;  %v5981_v4 = vld [vmem:[%s9141_s1 + $0x14] ss:$8 sps:$4 sm:$0xff]  }
   0x2   :  { %v5977_v1 = vld [vmem:[%s9141_s1 + $0x404] ss:$8 sps:$4 sm:$0xff]   ;;  %3113 = vmatprep.subr.bf16.mxu1 %v5975_v0  ;;  %v5980_v3 = vld [vmem:[%s9141_s1 + $0x400] ss:$8 sps:$4 sm:$0xff]   ;;  %v5983_v5 = vld [vmem:[%s9141_s1 + $0x414] ss:$8 sps:$4 sm:$0xff]  }
   0x3   :  { %3757 = vmatprep.subr.bf16.mxu0 %v5977_v1  ;;  %3114 = vmatpush1.bf16.msra.mxu1 %v5979_v2  ;;  %v5985_v6 = vld [vmem:[%s9141_s1 + $0x10] ss:$8 sps:$4 sm:$0xff]   ;;  %v5987_v8 = vld [vmem:[%s9141_s1 + $0x24] ss:$8 sps:$4 sm:$0xff]   ;;  %v5991_v10 = vld [vmem:[%s9141_s1 + $0x20] ss:$8 sps:$4 sm:$0xff]  }
   0x4   :  { %3758 = vmatpush1.bf16.msra.mxu0 %v5980_v3  ;;  %3115 = vmatprep.subr.bf16.mxu1 %v5981_v4  ;;  %v5986_v7 = vld [vmem:[%s9141_s1 + $0x410] ss:$8 sps:$4 sm:$0xff]   ;;  %v5989_v9 = vld [vmem:[%s9141_s1 + $0x424] ss:$8 sps:$4 sm:$0xff]   ;;  %v5992_v11 = vld [vmem:[%s9141_s1 + $0x420] ss:$8 sps:$4 sm:$0xff]  }
   0x5   :  { %3759 = vmatprep.subr.bf16.mxu0 %v5983_v5  ;;  %v5993_v12 = vld [vmem:[%s9141_s1 + $0x34] ss:$8 sps:$4 sm:$0xff]   ;;  %v5997_v14 = vld [vmem:[%s9141_s1 + $0x30] ss:$8 sps:$4 sm:$0xff]   ;;  %v5999_v16 = vld [vmem:[%s9141_s1 + $0x44] ss:$8 sps:$4 sm:$0xff]  }
   0x6   :  { %v5995_v13 = vld [vmem:[%s9141_s1 + $0x434] ss:$8 sps:$4 sm:$0xff]   ;;  %v5998_v15 = vld [vmem:[%s9141_s1 + $0x430] ss:$8 sps:$4 sm:$0xff]   ;;  %v6001_v17 = vld [vmem:[%s9141_s1 + $0x444] ss:$8 sps:$4 sm:$0xff]  }
   0x7   :  { %3116 = vmatpush1.bf16.msra.mxu1 %v5985_v6  ;;  %v6003_v18 = vld [vmem:[%s9141_s1 + $0x40] ss:$8 sps:$4 sm:$0xff]   ;;  %v6005_v20 = vld [vmem:[%s9141_s1 + $0x54] ss:$8 sps:$4 sm:$0xff]   ;;  %v6009_v22 = vld [vmem:[%s9141_s1 + $0x50] ss:$8 sps:$4 sm:$0xff]  }
   0x8   :  { %3760 = vmatpush1.bf16.msra.mxu0 %v5986_v7  ;;  %3117 = vmatprep.subr.bf16.mxu1 %v5987_v8  ;;  %v6004_v19 = vld [vmem:[%s9141_s1 + $0x440] ss:$8 sps:$4 sm:$0xff]   ;;  %v6007_v21 = vld [vmem:[%s9141_s1 + $0x454] ss:$8 sps:$4 sm:$0xff]   ;;  %v6010_v23 = vld [vmem:[%s9141_s1 + $0x450] ss:$8 sps:$4 sm:$0xff]  }
   0x9   :  { %3761 = vmatprep.subr.bf16.mxu0 %v5989_v9  ;;  %v6011_v24 = vld [vmem:[%s9141_s1 + $0x64] ss:$8 sps:$4 sm:$0xff]   ;;  %v6015_v26 = vld [vmem:[%s9141_s1 + $0x60] ss:$8 sps:$4 sm:$0xff]   ;;  %v6017_v28 = vld [vmem:[%s9141_s1 + $0x74] ss:$8 sps:$4 sm:$0xff]  }
   0xa   :  { %v6013_v25 = vld [vmem:[%s9141_s1 + $0x464] ss:$8 sps:$4 sm:$0xff]   ;;  %v6016_v27 = vld [vmem:[%s9141_s1 + $0x460] ss:$8 sps:$4 sm:$0xff]   ;;  %v6019_v29 = vld [vmem:[%s9141_s1 + $0x474] ss:$8 sps:$4 sm:$0xff]  }
   0xb   :  { %3118 = vmatpush1.bf16.msra.mxu1 %v5991_v10  ;;  %v6021_v30 = vld [vmem:[%s9141_s1 + $0x70] ss:$8 sps:$4 sm:$0xff]   ;;  %v6023_v32 = vld [vmem:[%s9141_s1 + $0x84] ss:$8 sps:$4 sm:$0xff]   ;;  %v6027_v34 = vld [vmem:[%s9141_s1 + $0x80] ss:$8 sps:$4 sm:$0xff]  }
   0xc   :  { %3762 = vmatpush1.bf16.msra.mxu0 %v5992_v11  ;;  %3119 = vmatprep.subr.bf16.mxu1 %v5993_v12  ;;  %v6022_v31 = vld [vmem:[%s9141_s1 + $0x470] ss:$8 sps:$4 sm:$0xff]   ;;  %v6025_v33 = vld [vmem:[%s9141_s1 + $0x484] ss:$8 sps:$4 sm:$0xff]   ;;  %v6028_v35 = vld [vmem:[%s9141_s1 + $0x480] ss:$8 sps:$4 sm:$0xff]  }
   0xd   :  { %3763 = vmatprep.subr.bf16.mxu0 %v5995_v13  ;;  %v6029_v36 = vld [vmem:[%s9141_s1 + $0x94] ss:$8 sps:$4 sm:$0xff]   ;;  %v6033_v38 = vld [vmem:[%s9141_s1 + $0x90] ss:$8 sps:$4 sm:$0xff]   ;;  %v6035_v40 = vld [vmem:[%s9141_s1 + $0xa4] ss:$8 sps:$4 sm:$0xff]  }
   0xe   :  { %v6031_v37 = vld [vmem:[%s9141_s1 + $0x494] ss:$8 sps:$4 sm:$0xff]   ;;  %v6034_v39 = vld [vmem:[%s9141_s1 + $0x490] ss:$8 sps:$4 sm:$0xff]   ;;  %v6037_v41 = vld [vmem:[%s9141_s1 + $0x4a4] ss:$8 sps:$4 sm:$0xff]  }
   0xf   :  { %3120 = vmatpush1.bf16.msra.mxu1 %v5997_v14  ;;  %v6039_v42 = vld [vmem:[%s9141_s1 + $0xa0] ss:$8 sps:$4 sm:$0xff]   ;;  %v6041_v44 = vld [vmem:[%s9141_s1 + $0xb4] ss:$8 sps:$4 sm:$0xff]   ;;  %v6045_v46 = vld [vmem:[%s9141_s1 + $0xb0] ss:$8 sps:$4 sm:$0xff]  }
  0x10   :  { %3764 = vmatpush1.bf16.msra.mxu0 %v5998_v15  ;;  %3121 = vmatprep.subr.bf16.mxu1 %v5999_v16  ;;  %v6040_v43 = vld [vmem:[%s9141_s1 + $0x4a0] ss:$8 sps:$4 sm:$0xff]   ;;  %v6043_v45 = vld [vmem:[%s9141_s1 + $0x4b4] ss:$8 sps:$4 sm:$0xff]   ;;  %v6046_v47 = vld [vmem:[%s9141_s1 + $0x4b0] ss:$8 sps:$4 sm:$0xff]  }
  0x11   :  { %3765 = vmatprep.subr.bf16.mxu0 %v6001_v17  ;;  %v6047_v48 = vld [vmem:[%s9141_s1 + $0xc4] ss:$8 sps:$4 sm:$0xff]   ;;  %v6051_v52 = vld [vmem:[%s9141_s1 + $0xc0] ss:$8 sps:$4 sm:$0xff]   ;;  %v6053_v54 = vld [vmem:[%s9141_s1 + $0xd4] ss:$8 sps:$4 sm:$0xff]  }
  0x12   :  { %v6073_v49 = vld [vmem:[%s9142_s0 + $0x4] ss:$72 sps:$4 sm:$0xff]   ;;  %v6052_v53 = vld [vmem:[%s9141_s1 + $0x4c0] ss:$8 sps:$4 sm:$0xff]   ;;  %v6055_v55 = vld [vmem:[%s9141_s1 + $0x4d4] ss:$8 sps:$4 sm:$0xff]  }
  0x13   :  { %3122 = vmatpush1.bf16.msra.mxu1 %v6003_v18  ;;  %v6049_v50 = vld [vmem:[%s9141_s1 + $0x4c4] ss:$8 sps:$4 sm:$0xff]   ;;  %3145 = vmatprep.mubr.bf16.mxu1 %v6073_v49  ;;  %v6057_v56 = vld [vmem:[%s9141_s1 + $0xd0] ss:$8 sps:$4 sm:$0xff]   ;;  %v6063_v60 = vld [vmem:[%s9141_s1 + $0xe0] ss:$8 sps:$4 sm:$0xff]  }
  0x14   :  { %3766 = vmatpush1.bf16.msra.mxu0 %v6004_v19  ;;  %3123 = vmatprep.subr.bf16.mxu1 %v6005_v20  ;;  %v6076_v51 = vld [vmem:[%s9142_s0 + $0x24] ss:$72 sps:$4 sm:$0xff]   ;;  %v6058_v57 = vld [vmem:[%s9141_s1 + $0x4d0] ss:$8 sps:$4 sm:$0xff]   ;;  %v6064_v61 = vld [vmem:[%s9141_s1 + $0x4e0] ss:$8 sps:$4 sm:$0xff]  }
  0x15   :  { %3767 = vmatprep.subr.bf16.mxu0 %v6007_v21  ;;  %3789 = vmatprep.mubr.bf16.mxu0 %v6076_v51  ;;  %v6059_v58 = vld [vmem:[%s9141_s1 + $0xe4] ss:$8 sps:$4 sm:$0xff]   ;;  %v6065_v62 = vld [vmem:[%s9141_s1 + $0xf4] ss:$8 sps:$4 sm:$0xff]   ;;  %v6069_v0 = vld [vmem:[%s9141_s1 + $0xf0] ss:$8 sps:$4 sm:$0xff]  }
  0x16   :  { %v6061_v59 = vld [vmem:[%s9141_s1 + $0x4e4] ss:$8 sps:$4 sm:$0xff]   ;;  %v6067_v63 = vld [vmem:[%s9141_s1 + $0x4f4] ss:$8 sps:$4 sm:$0xff]   ;;  %v6070_v1 = vld [vmem:[%s9141_s1 + $0x4f0] ss:$8 sps:$4 sm:$0xff]  }
  0x17   :  { %3124 = vmatpush1.bf16.msra.mxu1 %v6009_v22  ;;  %v6071_v2 = vld [vmem:[%s9142_s0] ss:$72 sps:$4 sm:$0xff]   ;;  %v6079_v3 = vld [vmem:[%s9141_s1 + $0x504] ss:$8 sps:$4 sm:$0xff]   ;;  %v6080_v7 = vld [vmem:[%s9142_s0 + $0x94] ss:$72 sps:$4 sm:$0xff]  }
  0x18   :  { %3768 = vmatpush1.bf16.msra.mxu0 %v6010_v23  ;;  %3125 = vmatprep.subr.bf16.mxu1 %v6011_v24  ;;  %v6114_v4 = vld [vmem:[%s9141_s1 + $0x104] ss:$8 sps:$4 sm:$0xff]   ;;  %v6074_v5 = vld [vmem:[%s9142_s0 + $0x20] ss:$72 sps:$4 sm:$0xff]   ;;  %v6082_v8 = vld [vmem:[%s9142_s0 + $0xb4] ss:$72 sps:$4 sm:$0xff]  }
  0x19   :  { %3769 = vmatprep.subr.bf16.mxu0 %v6013_v25  ;;  %v6077_v6 = vld [vmem:[%s9141_s1 + $0x500] ss:$8 sps:$4 sm:$0xff]   ;;  %v6086_v9 = vld [vmem:[%s9141_s1 + $0x514] ss:$8 sps:$4 sm:$0xff]   ;;  %v6084_v12 = vld [vmem:[%s9141_s1 + $0x510] ss:$8 sps:$4 sm:$0xff]  }
  0x1a   :  { %v6112_v10 = vld [vmem:[%s9141_s1 + $0x100] ss:$8 sps:$4 sm:$0xff]   ;;  %v6124_v11 = vld [vmem:[%s9141_s1 + $0x114] ss:$8 sps:$4 sm:$0xff]   ;;  %v6087_v13 = vld [vmem:[%s9142_s0 + $0x90] ss:$72 sps:$4 sm:$0xff]  }
  0x1b   :  { %3126 = vmatpush1.bf16.msra.mxu1 %v6015_v26  ;;  %v6091_v14 = vld [vmem:[%s9141_s1 + $0x524] ss:$8 sps:$4 sm:$0xff]   ;;  %v6088_v15 = vld [vmem:[%s9142_s0 + $0xb0] ss:$72 sps:$4 sm:$0xff]   ;;  %v6089_v17 = vld [vmem:[%s9141_s1 + $0x520] ss:$8 sps:$4 sm:$0xff]  }
  0x1c   :  { %3770 = vmatpush1.bf16.msra.mxu0 %v6016_v27  ;;  %3127 = vmatprep.subr.bf16.mxu1 %v6017_v28  ;;  %v6122_v16 = vld [vmem:[%s9141_s1 + $0x110] ss:$8 sps:$4 sm:$0xff]   ;;  %v6092_v18 = vld [vmem:[%s9142_s0 + $0x124] ss:$72 sps:$4 sm:$0xff]   ;;  %v6100_v20 = vld [vmem:[%s9141_s1 + $0x534] ss:$8 sps:$4 sm:$0xff]  }
  0x1d   :  { %3771 = vmatprep.subr.bf16.mxu0 %v6019_v29  ;;  %v6094_v19 = vld [vmem:[%s9142_s0 + $0x144] ss:$72 sps:$4 sm:$0xff]   ;;  %v6098_v22 = vld [vmem:[%s9141_s1 + $0x530] ss:$8 sps:$4 sm:$0xff]   ;;  %v6134_v23 = vld [vmem:[%s9141_s1 + $0x120] ss:$8 sps:$4 sm:$0xff]  }
  0x1e   :  { %v6136_v21 = vld [vmem:[%s9141_s1 + $0x124] ss:$8 sps:$4 sm:$0xff]   ;;  %v6148_v25 = vld [vmem:[%s9141_s1 + $0x134] ss:$8 sps:$4 sm:$0xff]   ;;  %v6096_v26 = vld [vmem:[%s9142_s0 + $0x120] ss:$72 sps:$4 sm:$0xff]  }
  0x1f   :  { %3128 = vmatpush1.bf16.msra.mxu1 %v6021_v30  ;;  %v6109_v24 = vld [vmem:[%s9141_s1 + $0x544] ss:$8 sps:$4 sm:$0xff]   ;;  %v6097_v27 = vld [vmem:[%s9142_s0 + $0x140] ss:$72 sps:$4 sm:$0xff]   ;;  %v6101_v28 = vld [vmem:[%s9142_s0 + $0x1b4] ss:$72 sps:$4 sm:$0xff]  }
  0x20   :  { %3772 = vmatpush1.bf16.msra.mxu0 %v6022_v31  ;;  %3129 = vmatprep.subr.bf16.mxu1 %v6023_v32  ;;  %v6103_v29 = vld [vmem:[%s9142_s0 + $0x1d4] ss:$72 sps:$4 sm:$0xff]   ;;  %v6107_v30 = vld [vmem:[%s9141_s1 + $0x540] ss:$8 sps:$4 sm:$0xff]   ;;  %v6146_v31 = vld [vmem:[%s9141_s1 + $0x130] ss:$8 sps:$4 sm:$0xff]  }
  0x21   :  { %3773 = vmatprep.subr.bf16.mxu0 %v6025_v33  ;;  %v6121_v32 = vld [vmem:[%s9141_s1 + $0x554] ss:$8 sps:$4 sm:$0xff]   ;;  %v6159_v33 = vld [vmem:[%s9141_s1 + $0x144] ss:$8 sps:$4 sm:$0xff]   ;;  %v6172_v49 = vld [vmem:[%s9141_s1 + $0x160] ss:$8 sps:$4 sm:$0xff]  }
  0x22   :  { %v6118_v51 = vld [vmem:[%s9142_s0 + $0x260] ss:$72 sps:$4 sm:$0xff]  }
  0x23   :  { %3130 = vmatpush1.bf16.msra.mxu1 %v6027_v34  ;;  %v6119_v34 = vld [vmem:[%s9141_s1 + $0x550] ss:$8 sps:$4 sm:$0xff]  }
  0x24   :  { %3774 = vmatpush1.bf16.msra.mxu0 %v6028_v35  ;;  %3131 = vmatprep.subr.bf16.mxu1 %v6029_v36  ;;  %v6131_v35 = vld [vmem:[%s9141_s1 + $0x564] ss:$8 sps:$4 sm:$0xff]   ;;  %v6105_v36 = vld [vmem:[%s9142_s0 + $0x1b0] ss:$72 sps:$4 sm:$0xff]  }
  0x25   :  { %3775 = vmatprep.subr.bf16.mxu0 %v6031_v37  ;;  %v6157_v37 = vld [vmem:[%s9141_s1 + $0x140] ss:$8 sps:$4 sm:$0xff]  }
  0x27   :  { %3132 = vmatpush1.bf16.msra.mxu1 %v6033_v38  ;;  %v6166_v38 = vld [vmem:[%s9141_s1 + $0x154] ss:$8 sps:$4 sm:$0xff]  }
  0x28   :  { %3776 = vmatpush1.bf16.msra.mxu0 %v6034_v39  ;;  %3133 = vmatprep.subr.bf16.mxu1 %v6035_v40  ;;  %v6106_v39 = vld [vmem:[%s9142_s0 + $0x1d0] ss:$72 sps:$4 sm:$0xff]   ;;  %v6110_v40 = vld [vmem:[%s9142_s0 + $0x244] ss:$72 sps:$4 sm:$0xff]  }
  0x29   :  { %3777 = vmatprep.subr.bf16.mxu0 %v6037_v41  ;;  %v6115_v41 = vld [vmem:[%s9142_s0 + $0x264] ss:$72 sps:$4 sm:$0xff]  }
  0x2b   :  { %3134 = vmatpush1.bf16.msra.mxu1 %v6039_v42  ;;  %v6129_v42 = vld [vmem:[%s9141_s1 + $0x560] ss:$8 sps:$4 sm:$0xff]  }
  0x2c   :  { %3778 = vmatpush1.bf16.msra.mxu0 %v6040_v43  ;;  %3135 = vmatprep.subr.bf16.mxu1 %v6041_v44  ;;  %v6164_v43 = vld [vmem:[%s9141_s1 + $0x150] ss:$8 sps:$4 sm:$0xff]   ;;  %v6139_v44 = vld [vmem:[%s9141_s1 + $0x574] ss:$8 sps:$4 sm:$0xff]  }
  0x2d   :  { %3779 = vmatprep.subr.bf16.mxu0 %v6043_v45  ;;  %v6174_v45 = vld [vmem:[%s9141_s1 + $0x164] ss:$8 sps:$4 sm:$0xff]  }
  0x2f   :  { %3136 = vmatpush1.bf16.msra.mxu1 %v6045_v46  ;;  %v6137_v46 = vld [vmem:[%s9141_s1 + $0x570] ss:$8 sps:$4 sm:$0xff]  }
  0x30   :  { %3780 = vmatpush1.bf16.msra.mxu0 %v6046_v47  ;;  %3137 = vmatprep.subr.bf16.mxu1 %v6047_v48  ;;  %v6151_v47 = vld [vmem:[%s9141_s1 + $0x584] ss:$8 sps:$4 sm:$0xff]   ;;  %v6117_v48 = vld [vmem:[%s9142_s0 + $0x240] ss:$72 sps:$4 sm:$0xff]  }
  0x31   :  { %3781 = vmatprep.subr.bf16.mxu0 %v6049_v50  ;;  %v6181_v50 = vld [vmem:[%s9141_s1 + $0x174] ss:$8 sps:$4 sm:$0xff]  }
  0x33   :  { %3138 = vmatpush1.bf16.msra.mxu1 %v6051_v52  ;;  %v6125_v52 = vld [vmem:[%s9142_s0 + $0x2d4] ss:$72 sps:$4 sm:$0xff]  }
  0x34   :  { %3782 = vmatpush1.bf16.msra.mxu0 %v6052_v53  ;;  %3139 = vmatprep.subr.bf16.mxu1 %v6053_v54  ;;  %v6127_v53 = vld [vmem:[%s9142_s0 + $0x2f4] ss:$72 sps:$4 sm:$0xff]   ;;  %v6149_v54 = vld [vmem:[%s9141_s1 + $0x580] ss:$8 sps:$4 sm:$0xff]  }
  0x35   :  { %3783 = vmatprep.subr.bf16.mxu0 %v6055_v55  ;;  %v6179_v55 = vld [vmem:[%s9141_s1 + $0x170] ss:$8 sps:$4 sm:$0xff]  }
  0x37   :  { %3140 = vmatpush1.bf16.msra.mxu1 %v6057_v56  ;;  %v6163_v56 = vld [vmem:[%s9141_s1 + $0x594] ss:$8 sps:$4 sm:$0xff]  }
  0x38   :  { %3784 = vmatpush1.bf16.msra.mxu0 %v6058_v57  ;;  %3141 = vmatprep.subr.bf16.mxu1 %v6059_v58  ;;  %v6189_v57 = vld [vmem:[%s9141_s1 + $0x184] ss:$8 sps:$4 sm:$0xff]   ;;  %v6161_v58 = vld [vmem:[%s9141_s1 + $0x590] ss:$8 sps:$4 sm:$0xff]  }
  0x39   :  { %3785 = vmatprep.subr.bf16.mxu0 %v6061_v59  ;;  %v6178_v59 = vld [vmem:[%s9141_s1 + $0x5a4] ss:$8 sps:$4 sm:$0xff]  }
  0x3b   :  { %3142 = vmatpush1.bf16.msra.mxu1 %v6063_v60  ;;  %v6132_v60 = vld [vmem:[%s9142_s0 + $0x2d0] ss:$72 sps:$4 sm:$0xff]  }
  0x3c   :  { %3786 = vmatpush1.bf16.msra.mxu0 %v6064_v61  ;;  %3143 = vmatprep.subr.bf16.mxu1 %v6065_v62  ;;  %v6187_v61 = vld [vmem:[%s9141_s1 + $0x180] ss:$8 sps:$4 sm:$0xff]   ;;  %v6196_v62 = vld [vmem:[%s9141_s1 + $0x194] ss:$8 sps:$4 sm:$0xff]  }
  0x3d   :  { %3787 = vmatprep.subr.bf16.mxu0 %v6067_v63  ;;  %v6133_v63 = vld [vmem:[%s9142_s0 + $0x2f0] ss:$72 sps:$4 sm:$0xff]  }
  0x3f   :  { %3144 = vmatpush1.bf16.msra.mxu1 %v6069_v0  ;;  %v6140_v0 = vld [vmem:[%s9142_s0 + $0x364] ss:$72 sps:$4 sm:$0xff]  }
  0x40   :  { %3788 = vmatpush1.bf16.msra.mxu0 %v6070_v1  ;;  %3274 = vmatprep.subr.bf16.mxu1 %v6114_v4  ;;  %v6142_v1 = vld [vmem:[%s9142_s0 + $0x384] ss:$72 sps:$4 sm:$0xff]   ;;  %v6193_v4 = vld [vmem:[%s9141_s1 + $0x5b4] ss:$8 sps:$4 sm:$0xff]  }
  0x41   :  { %3918 = vmatprep.subr.bf16.mxu0 %v6079_v3  ;;  %v6194_v3 = vld [vmem:[%s9141_s1 + $0x190] ss:$8 sps:$4 sm:$0xff]  }
  0x42   :  { %3146 = vmatmul.mubr.bf16.vlgmr.msra.gmra.mrb[0].mxu1 %v6071_v2  ;;  %v6176_v2 = vld [vmem:[%s9141_s1 + $0x5a0] ss:$8 sps:$4 sm:$0xff]  }
  0x43   :  { %3790 = vmatmul.mubr.bf16.vlgmr.msra.gmra.mrb[0].mxu0 %v6074_v5  ;;  %3155 = vmatprep.mubr.bf16.mxu1 %v6080_v7  ;;  %v6207_v5 = vld [vmem:[%s9141_s1 + $0x1a4] ss:$8 sps:$4 sm:$0xff]   ;;  %v6144_v7 = vld [vmem:[%s9142_s0 + $0x360] ss:$72 sps:$4 sm:$0xff]  }
  0x44   :  { %3919 = vmatpush1.bf16.msra.mxu0 %v6077_v6  ;;  %3799 = vmatprep.mubr.bf16.mxu0 %v6082_v8  ;;  %v6191_v6 = vld [vmem:[%s9141_s1 + $0x5b0] ss:$8 sps:$4 sm:$0xff]   ;;  %v6205_v8 = vld [vmem:[%s9141_s1 + $0x1a0] ss:$8 sps:$4 sm:$0xff]  }
  0x45   :  { %3920 = vmatprep.subr.bf16.mxu0 %v6086_v9  ;;  %3275 = vmatpush1.bf16.msra.mxu1 %v6112_v10  ;;  %v6199_v9 = vld [vmem:[%s9141_s1 + $0x5c4] ss:$8 sps:$4 sm:$0xff]   ;;  %v6211_v10 = vld [vmem:[%s9141_s1 + $0x1b4] ss:$8 sps:$4 sm:$0xff]  }
  0x46   :  { %3276 = vmatprep.subr.bf16.mxu1 %v6124_v11  ;;  %v6145_v11 = vld [vmem:[%s9142_s0 + $0x380] ss:$72 sps:$4 sm:$0xff]  }
  0x48   :  { %3921 = vmatpush1.bf16.msra.mxu0 %v6084_v12  ;;  %v6152_v12 = vld [vmem:[%s9142_s0 + $0x3f4] ss:$72 sps:$4 sm:$0xff]  }
  0x49   :  { %3922 = vmatprep.subr.bf16.mxu0 %v6091_v14  ;;  %3277 = vmatpush1.bf16.msra.mxu1 %v6122_v16  ;;  %v6197_v14 = vld [vmem:[%s9141_s1 + $0x5c0] ss:$8 sps:$4 sm:$0xff]   ;;  %v6214_v16 = vld [vmem:[%s9141_s1 + $0x5d4] ss:$8 sps:$4 sm:$0xff]  }
  0x4a   :  { %3156 = vmatmul.mubr.bf16.gmra.mrb[4].mxu1 %v6087_v13  ;;  %3278 = vmatprep.subr.bf16.mxu1 %v6136_v21  ;;  %v6154_v13 = vld [vmem:[%s9142_s0 + $0x414] ss:$72 sps:$4 sm:$0xff]   ;;  %v6220_v21 = vld [vmem:[%s9141_s1 + $0x1c0] ss:$8 sps:$4 sm:$0xff]  }
  0x4b   :  { %3800 = vmatmul.mubr.bf16.gmra.mrb[4].mxu0 %v6088_v15  ;;  %3165 = vmatprep.mubr.bf16.mxu1 %v6092_v18  ;;  %v6209_v15 = vld [vmem:[%s9141_s1 + $0x1b0] ss:$8 sps:$4 sm:$0xff]  }
  0x4c   :  { %3923 = vmatpush1.bf16.msra.mxu0 %v6089_v17  ;;  %3809 = vmatprep.mubr.bf16.mxu0 %v6094_v19  ;;  %v6222_v17 = vld [vmem:[%s9141_s1 + $0x1c4] ss:$8 sps:$4 sm:$0xff]   ;;  %v6212_v18 = vld [vmem:[%s9141_s1 + $0x5d0] ss:$8 sps:$4 sm:$0xff]  }
  0x4d   :  { %3924 = vmatprep.subr.bf16.mxu0 %v6100_v20  ;;  %3279 = vmatpush1.bf16.msra.mxu1 %v6134_v23  ;;  %v6156_v19 = vld [vmem:[%s9142_s0 + $0x3f0] ss:$72 sps:$4 sm:$0xff]   ;;  %v6229_v23 = vld [vmem:[%s9141_s1 + $0x1d4] ss:$8 sps:$4 sm:$0xff]  }
  0x4e   :  { %3280 = vmatprep.subr.bf16.mxu1 %v6148_v25  ;;  %v6160_v20 = vld [vmem:[%s9142_s0 + $0x410] ss:$72 sps:$4 sm:$0xff]   ;;  %v6169_v25 = vld [vmem:[%s9142_s0 + $0x4a4] ss:$72 sps:$4 sm:$0xff]  }
  0x50   :  { %3925 = vmatpush1.bf16.msra.mxu0 %v6098_v22  ;;  %v6226_v22 = vld [vmem:[%s9141_s1 + $0x5e4] ss:$8 sps:$4 sm:$0xff]  }
  0x51   :  { %3926 = vmatprep.subr.bf16.mxu0 %v6109_v24  ;;  %3281 = vmatpush1.bf16.msra.mxu1 %v6146_v31  ;;  %v6167_v24 = vld [vmem:[%s9142_s0 + $0x484] ss:$72 sps:$4 sm:$0xff]   ;;  %v6175_v31 = vld [vmem:[%s9142_s0 + $0x4a0] ss:$72 sps:$4 sm:$0xff]  }
  0x52   :  { %3166 = vmatmul.mubr.bf16.gmra.mrb[8].mxu1 %v6096_v26  ;;  %3282 = vmatprep.subr.bf16.mxu1 %v6159_v33  ;;  %v6224_v26 = vld [vmem:[%s9141_s1 + $0x5e0] ss:$8 sps:$4 sm:$0xff]   ;;  %v6237_v33 = vld [vmem:[%s9141_s1 + $0x5f0] ss:$8 sps:$4 sm:$0xff]  }
  0x53   :  { %3810 = vmatmul.mubr.bf16.gmra.mrb[8].mxu0 %v6097_v27  ;;  %3175 = vmatprep.mubr.bf16.mxu1 %v6101_v28  ;;  %v6227_v27 = vld [vmem:[%s9141_s1 + $0x1d0] ss:$8 sps:$4 sm:$0xff]   ;;  %v6235_v28 = vld [vmem:[%s9141_s1 + $0x1e4] ss:$8 sps:$4 sm:$0xff]  }
  0x54   :  { %3819 = vmatprep.mubr.bf16.mxu0 %v6103_v29  ;;  %3927 = vmatpush1.bf16.msra.mxu0 %v6107_v30  ;;  %v6239_v29 = vld [vmem:[%s9141_s1 + $0x5f4] ss:$8 sps:$4 sm:$0xff]   ;;  %v6171_v30 = vld [vmem:[%s9142_s0 + $0x480] ss:$72 sps:$4 sm:$0xff]  }
  0x55   :  { %3928 = vmatprep.subr.bf16.mxu0 %v6121_v32  ;;  %3283 = vmatpush1.bf16.msra.mxu1 %v6157_v37  ;;  %v6233_v32 = vld [vmem:[%s9141_s1 + $0x1e0] ss:$8 sps:$4 sm:$0xff]   ;;  %v6184_v37 = vld [vmem:[%s9142_s0 + $0x534] ss:$72 sps:$4 sm:$0xff]  }
  0x56   :  { %3284 = vmatprep.subr.bf16.mxu1 %v6166_v38  ;;  %v6240_v38 = vld [vmem:[%s9141_s1 + $0x1f0] ss:$8 sps:$4 sm:$0xff]  }
  0x58   :  { %3929 = vmatpush1.bf16.msra.mxu0 %v6119_v34  ;;  %v6242_v34 = vld [vmem:[%s9141_s1 + $0x1f4] ss:$8 sps:$4 sm:$0xff]  }
  0x59   :  { %3930 = vmatprep.subr.bf16.mxu0 %v6131_v35  ;;  %3285 = vmatpush1.bf16.msra.mxu1 %v6164_v43  ;;  %v6251_v35 = vld [vmem:[%s9141_s1 + $0x604] ss:$8 sps:$4 sm:$0xff]  }
  0x5a   :  { %3176 = vmatmul.mubr.bf16.gmra.mrb[12].mxu1 %v6105_v36  ;;  %3286 = vmatprep.subr.bf16.mxu1 %v6174_v45  ;;  %v6182_v36 = vld [vmem:[%s9142_s0 + $0x514] ss:$72 sps:$4 sm:$0xff]   ;;  %v6286_v43 = vld [vmem:[%s9141_s1 + $0x204] ss:$8 sps:$4 sm:$0xff]   ;;  %v6208_v45 = vld [vmem:[%s9142_s0 + $0x5c0] ss:$72 sps:$4 sm:$0xff]  }
  0x5b   :  { %3820 = vmatmul.mubr.bf16.gmra.mrb[12].mxu0 %v6106_v39  ;;  %3185 = vmatprep.mubr.bf16.mxu1 %v6110_v40  ;;  %v6186_v39 = vld [vmem:[%s9142_s0 + $0x510] ss:$72 sps:$4 sm:$0xff]  }
  0x5c   :  { %3829 = vmatprep.mubr.bf16.mxu0 %v6115_v41  ;;  %3931 = vmatpush1.bf16.msra.mxu0 %v6129_v42  ;;  %v6190_v40 = vld [vmem:[%s9142_s0 + $0x530] ss:$72 sps:$4 sm:$0xff]   ;;  %v6200_v41 = vld [vmem:[%s9142_s0 + $0x5a4] ss:$72 sps:$4 sm:$0xff]  }
  0x5d   :  { %3932 = vmatprep.subr.bf16.mxu0 %v6139_v44  ;;  %3287 = vmatpush1.bf16.msra.mxu1 %v6172_v49  ;;  %v6202_v42 = vld [vmem:[%s9142_s0 + $0x5c4] ss:$72 sps:$4 sm:$0xff]   ;;  %v6204_v44 = vld [vmem:[%s9142_s0 + $0x5a0] ss:$72 sps:$4 sm:$0xff]  }
  0x5e   :  { %3288 = vmatprep.subr.bf16.mxu1 %v6181_v50  ;;  %v237_v49 = vld [vmem:[%s9142_s0 + $0x6e0] sm:$0x33]  ;;  %v6219_v50 = vld [vmem:[%s9142_s0 + $0x630] ss:$72 sps:$4 sm:$0xff]  }
  0x60   :  { %3933 = vmatpush1.bf16.msra.mxu0 %v6137_v46  ;;  %v6215_v46 = vld [vmem:[%s9142_s0 + $0x634] ss:$72 sps:$4 sm:$0xff]  }
  0x61   :  { %3934 = vmatprep.subr.bf16.mxu0 %v6151_v47  ;;  %3289 = vmatpush1.bf16.msra.mxu1 %v6179_v55  ;;  %v6217_v47 = vld [vmem:[%s9142_s0 + $0x654] ss:$72 sps:$4 sm:$0xff]   ;;  %v5232_v55 = vcombine.low %v237_v49, %v237_v49 }
  0x62   :  { %3186 = vmatmul.mubr.bf16.gmra.mrb[16].mxu1 %v6117_v48  ;;  %3290 = vmatprep.subr.bf16.mxu1 %v6189_v57  ;;  %v233_v48 = vld [vmem:[%s9142_s0 + $0x6c0] sm:$0x33]  ;;  %v6248_v57 = vld [vmem:[%s9142_s0 + $0x2c] ss:$72 sps:$4 sm:$0xff]  }
  0x63   :  { %3830 = vmatmul.mubr.bf16.gmra.mrb[16].mxu0 %v6118_v51  ;;  %3195 = vmatprep.mubr.bf16.mxu1 %v6125_v52  ;;  %v6223_v51 = vld [vmem:[%s9142_s0 + $0x650] ss:$72 sps:$4 sm:$0xff]   ;;  %v5225_v52 = vcombine.high %v233_v48, %v233_v48 }
  0x64   :  { %3839 = vmatprep.mubr.bf16.mxu0 %v6127_v53  ;;  %3935 = vmatpush1.bf16.msra.mxu0 %v6149_v54  ;;  %v5233_v53 = vcombine.high %v237_v49, %v237_v49  ;;  %v5224_v54 = vcombine.low %v233_v48, %v233_v48  ;;  %v6333_v48 = vld [vmem:[%s9141_s1 + $0x690] ss:$8 sps:$4 sm:$0xff]  }
  0x65   :  { %3936 = vmatprep.subr.bf16.mxu0 %v6163_v56  ;;  %3291 = vmatpush1.bf16.msra.mxu1 %v6187_v61  ;;  %v6245_v56 = vld [vmem:[%s9142_s0 + $0xc] ss:$72 sps:$4 sm:$0xff]   ;;  %v6252_v61 = vld [vmem:[%s9142_s0 + $0x9c] ss:$72 sps:$4 sm:$0xff]   ;;  %v6304_v49 = vld [vmem:[%s9142_s0 + $0x2d8] ss:$72 sps:$4 sm:$0xff]  }
  0x66   :  { %3292 = vmatprep.subr.bf16.mxu1 %v6196_v62  ;;  %v6254_v62 = vld [vmem:[%s9142_s0 + $0xbc] ss:$72 sps:$4 sm:$0xff]  }
  0x68   :  { %3937 = vmatpush1.bf16.msra.mxu0 %v6161_v58  ;;  %v6243_v58 = vld [vmem:[%s9142_s0 + $0x8] ss:$72 sps:$4 sm:$0xff]  }
  0x69   :  { %3938 = vmatprep.subr.bf16.mxu0 %v6178_v59  ;;  %3293 = vmatpush1.bf16.msra.mxu1 %v6194_v3  ;;  %v6246_v59 = vld [vmem:[%s9142_s0 + $0x28] ss:$72 sps:$4 sm:$0xff]   ;;  %v6259_v3 = vld [vmem:[%s9142_s0 + $0x98] ss:$72 sps:$4 sm:$0xff]  }
  0x6a   :  { %3196 = vmatmul.mubr.bf16.gmra.mrb[20].mxu1 %v6132_v60  ;;  %3294 = vmatprep.subr.bf16.mxu1 %v6207_v5  ;;  %v6249_v60 = vld [vmem:[%s9141_s1 + $0x600] ss:$8 sps:$4 sm:$0xff]   ;;  %v6263_v5 = vld [vmem:[%s9141_s1 + $0x624] ss:$8 sps:$4 sm:$0xff]  }
  0x6b   :  { %3840 = vmatmul.mubr.bf16.gmra.mrb[20].mxu0 %v6133_v63  ;;  %3205 = vmatprep.mubr.bf16.mxu1 %v6140_v0  ;;  %v6258_v63 = vld [vmem:[%s9141_s1 + $0x614] ss:$8 sps:$4 sm:$0xff]   ;;  %v6284_v0 = vld [vmem:[%s9141_s1 + $0x200] ss:$8 sps:$4 sm:$0xff]  }
  0x6c   :  { %3849 = vmatprep.mubr.bf16.mxu0 %v6142_v1  ;;  %3939 = vmatpush1.bf16.msra.mxu0 %v6176_v2  ;;  %v6296_v1 = vld [vmem:[%s9141_s1 + $0x214] ss:$8 sps:$4 sm:$0xff]   ;;  %v6256_v2 = vld [vmem:[%s9141_s1 + $0x610] ss:$8 sps:$4 sm:$0xff]  }
  0x6d   :  { %3940 = vmatprep.subr.bf16.mxu0 %v6193_v4  ;;  %3295 = vmatpush1.bf16.msra.mxu1 %v6205_v8  ;;  %v6260_v4 = vld [vmem:[%s9142_s0 + $0xb8] ss:$72 sps:$4 sm:$0xff]   ;;  %v6264_v8 = vld [vmem:[%s9142_s0 + $0x12c] ss:$72 sps:$4 sm:$0xff]  }
  0x6e   :  { %3296 = vmatprep.subr.bf16.mxu1 %v6211_v10  ;;  %v6272_v10 = vld [vmem:[%s9141_s1 + $0x634] ss:$8 sps:$4 sm:$0xff]  }
  0x70   :  { %3941 = vmatpush1.bf16.msra.mxu0 %v6191_v6  ;;  %v6294_v6 = vld [vmem:[%s9141_s1 + $0x210] ss:$8 sps:$4 sm:$0xff]  }
  0x71   :  { %3942 = vmatprep.subr.bf16.mxu0 %v6199_v9  ;;  %3297 = vmatpush1.bf16.msra.mxu1 %v6209_v15  ;;  %v6266_v9 = vld [vmem:[%s9142_s0 + $0x14c] ss:$72 sps:$4 sm:$0xff]   ;;  %v6268_v15 = vld [vmem:[%s9142_s0 + $0x128] ss:$72 sps:$4 sm:$0xff]  }
  0x72   :  { %3206 = vmatmul.mubr.bf16.gmra.mrb[24].mxu1 %v6144_v7  ;;  %3298 = vmatprep.subr.bf16.mxu1 %v6222_v17  ;;  %v6261_v7 = vld [vmem:[%s9141_s1 + $0x620] ss:$8 sps:$4 sm:$0xff]  }
  0x73   :  { %3850 = vmatmul.mubr.bf16.gmra.mrb[24].mxu0 %v6145_v11  ;;  %3215 = vmatprep.mubr.bf16.mxu1 %v6152_v12  ;;  %v6308_v11 = vld [vmem:[%s9141_s1 + $0x224] ss:$8 sps:$4 sm:$0xff]   ;;  %v6306_v12 = vld [vmem:[%s9141_s1 + $0x220] ss:$8 sps:$4 sm:$0xff]  }
  0x74   :  { %3859 = vmatprep.mubr.bf16.mxu0 %v6154_v13  ;;  %3943 = vmatpush1.bf16.msra.mxu0 %v6197_v14  ;;  %v6270_v13 = vld [vmem:[%s9141_s1 + $0x630] ss:$8 sps:$4 sm:$0xff]   ;;  %v6320_v14 = vld [vmem:[%s9141_s1 + $0x234] ss:$8 sps:$4 sm:$0xff]  }
  0x75   :  { %3944 = vmatprep.subr.bf16.mxu0 %v6214_v16  ;;  %3299 = vmatpush1.bf16.msra.mxu1 %v6220_v21  ;;  %v6281_v16 = vld [vmem:[%s9141_s1 + $0x644] ss:$8 sps:$4 sm:$0xff]   ;;  %v6269_v17 = vld [vmem:[%s9142_s0 + $0x148] ss:$72 sps:$4 sm:$0xff]   ;;  %v6293_v21 = vld [vmem:[%s9141_s1 + $0x654] ss:$8 sps:$4 sm:$0xff]  }
  0x76   :  { %3300 = vmatprep.subr.bf16.mxu1 %v6229_v23  ;;  %v6331_v23 = vld [vmem:[%s9141_s1 + $0x244] ss:$8 sps:$4 sm:$0xff]  }
  0x78   :  { %3945 = vmatpush1.bf16.msra.mxu0 %v6212_v18  ;;  %v6273_v18 = vld [vmem:[%s9142_s0 + $0x1bc] ss:$72 sps:$4 sm:$0xff]  }
  0x79   :  { %3946 = vmatprep.subr.bf16.mxu0 %v6226_v22  ;;  %3301 = vmatpush1.bf16.msra.mxu1 %v6227_v27  ;;  %v6318_v22 = vld [vmem:[%s9141_s1 + $0x230] ss:$8 sps:$4 sm:$0xff]   ;;  %v6329_v27 = vld [vmem:[%s9141_s1 + $0x240] ss:$8 sps:$4 sm:$0xff]  }
  0x7a   :  { %3216 = vmatmul.mubr.bf16.gmra.mrb[28].mxu1 %v6156_v19  ;;  %3302 = vmatprep.subr.bf16.mxu1 %v6235_v28  ;;  %v6275_v19 = vld [vmem:[%s9142_s0 + $0x1dc] ss:$72 sps:$4 sm:$0xff]  }
  0x7b   :  { %3860 = vmatmul.mubr.bf16.gmra.mrb[28].mxu0 %v6160_v20  ;;  %3225 = vmatprep.mubr.bf16.mxu1 %v6167_v24  ;;  %v6279_v20 = vld [vmem:[%s9141_s1 + $0x640] ss:$8 sps:$4 sm:$0xff]   ;;  %v6291_v24 = vld [vmem:[%s9141_s1 + $0x650] ss:$8 sps:$4 sm:$0xff]   ;;  %v6303_v28 = vld [vmem:[%s9141_s1 + $0x664] ss:$8 sps:$4 sm:$0xff]  }
  0x7c   :  { %3869 = vmatprep.mubr.bf16.mxu0 %v6169_v25  ;;  %3947 = vmatpush1.bf16.msra.mxu0 %v6224_v26  ;;  %v6277_v25 = vld [vmem:[%s9142_s0 + $0x1b8] ss:$72 sps:$4 sm:$0xff]  }
  0x7d   :  { %3948 = vmatprep.subr.bf16.mxu0 %v6239_v29  ;;  %3303 = vmatpush1.bf16.msra.mxu1 %v6233_v32  ;;  %v6278_v26 = vld [vmem:[%s9142_s0 + $0x1d8] ss:$72 sps:$4 sm:$0xff]   ;;  %v6338_v29 = vld [vmem:[%s9141_s1 + $0x254] ss:$8 sps:$4 sm:$0xff]  }
  0x7e   :  { %3304 = vmatprep.subr.bf16.mxu1 %v6242_v34  ;;  %v6301_v32 = vld [vmem:[%s9141_s1 + $0x660] ss:$8 sps:$4 sm:$0xff]   ;;  %v6311_v34 = vld [vmem:[%s9141_s1 + $0x674] ss:$8 sps:$4 sm:$0xff]  }
  0x80   :  { %3949 = vmatpush1.bf16.msra.mxu0 %v6237_v33  ;;  %v6336_v33 = vld [vmem:[%s9141_s1 + $0x250] ss:$8 sps:$4 sm:$0xff]  }
  0x81   :  { %4079 = vmatprep.subr.bf16.mxu0 %v6251_v35  ;;  %3305 = vmatpush1.bf16.msra.mxu1 %v6240_v38  ;;  %v6346_v35 = vld [vmem:[%s9141_s1 + $0x264] ss:$8 sps:$4 sm:$0xff]   ;;  %v6289_v38 = vld [vmem:[%s9142_s0 + $0x248] ss:$72 sps:$4 sm:$0xff]  }
  0x82   :  { %3226 = vmatmul.mubr.bf16.gmra.mrb[32].mxu1 %v6171_v30  ;;  %3435 = vmatprep.subr.bf16.mxu1 %v6286_v43  ;;  %v6282_v30 = vld [vmem:[%s9142_s0 + $0x24c] ss:$72 sps:$4 sm:$0xff]   ;;  %v6299_v43 = vld [vmem:[%s9142_s0 + $0x2fc] ss:$72 sps:$4 sm:$0xff]  }
  0x83   :  { %3870 = vmatmul.mubr.bf16.gmra.mrb[32].mxu0 %v6175_v31  ;;  %3235 = vmatprep.mubr.bf16.mxu1 %v6182_v36  ;;  %v6287_v31 = vld [vmem:[%s9142_s0 + $0x26c] ss:$72 sps:$4 sm:$0xff]   ;;  %v6309_v36 = vld [vmem:[%s9141_s1 + $0x670] ss:$8 sps:$4 sm:$0xff]  }
  0x84   :  { %3879 = vmatprep.mubr.bf16.mxu0 %v6184_v37  ;;  %v6323_v37 = vld [vmem:[%s9141_s1 + $0x684] ss:$8 sps:$4 sm:$0xff]  }
  0x8a   :  { %3236 = vmatmul.mubr.bf16.gmra.mrb[36].mxu1 %v6186_v39  ;;  %v6344_v39 = vld [vmem:[%s9141_s1 + $0x260] ss:$8 sps:$4 sm:$0xff]  }
  0x8b   :  { %3880 = vmatmul.mubr.bf16.gmra.mrb[36].mxu0 %v6190_v40  ;;  %3245 = vmatprep.mubr.bf16.mxu1 %v6200_v41  ;;  %v6353_v40 = vld [vmem:[%s9141_s1 + $0x274] ss:$8 sps:$4 sm:$0xff]   ;;  %v6290_v41 = vld [vmem:[%s9142_s0 + $0x268] ss:$72 sps:$4 sm:$0xff]  }
  0x8c   :  { %3889 = vmatprep.mubr.bf16.mxu0 %v6202_v42  ;;  %v6297_v42 = vld [vmem:[%s9142_s0 + $0x2dc] ss:$72 sps:$4 sm:$0xff]  }
  0x92   :  { %3246 = vmatmul.mubr.bf16.gmra.mrb[40].mxu1 %v6204_v44  ;;  %v6321_v44 = vld [vmem:[%s9141_s1 + $0x680] ss:$8 sps:$4 sm:$0xff]  }
  0x93   :  { %3890 = vmatmul.mubr.bf16.gmra.mrb[40].mxu0 %v6208_v45  ;;  %3255 = vmatprep.mubr.bf16.mxu1 %v6215_v46  ;;  %v6351_v45 = vld [vmem:[%s9141_s1 + $0x270] ss:$8 sps:$4 sm:$0xff]   ;;  %v6335_v46 = vld [vmem:[%s9141_s1 + $0x694] ss:$8 sps:$4 sm:$0xff]  }
  0x94   :  { %3899 = vmatprep.mubr.bf16.mxu0 %v6217_v47  ;;  %v6361_v47 = vld [vmem:[%s9141_s1 + $0x284] ss:$8 sps:$4 sm:$0xff]  }
  0x9a   :  { %3256 = vmatmul.mubr.bf16.gmra.mrb[44].mxu1 %v6219_v50  ;;  %v6305_v50 = vld [vmem:[%s9142_s0 + $0x2f8] ss:$72 sps:$4 sm:$0xff]  }
  0x9b   :  { %3900 = vmatmul.mubr.bf16.gmra.mrb[44].mxu0 %v6223_v51  ;;  %3265 = vmatprep.mubr.bf16.mxu1 %v5225_v52  ;;  %v6359_v51 = vld [vmem:[%s9141_s1 + $0x280] ss:$8 sps:$4 sm:$0xff]   ;;  %v6350_v52 = vld [vmem:[%s9141_s1 + $0x6a4] ss:$8 sps:$4 sm:$0xff]  }
  0x9c   :  { %3909 = vmatprep.mubr.bf16.mxu0 %v5233_v53  ;;  %v6368_v53 = vld [vmem:[%s9141_s1 + $0x294] ss:$8 sps:$4 sm:$0xff]  }
  0xa2   :  { %3266 = vmatmul.mubr.bf16.gmra.mrb[48].mxu1 %v5224_v54  ;;  %v6312_v54 = vld [vmem:[%s9142_s0 + $0x36c] ss:$72 sps:$4 sm:$0xff]  }
  0xa3   :  { %3910 = vmatmul.mubr.bf16.gmra.mrb[48].mxu0 %v5232_v55  ;;  %3306 = vmatprep.mubr.bf16.mxu1 %v6245_v56  ;;  %v6314_v55 = vld [vmem:[%s9142_s0 + $0x38c] ss:$72 sps:$4 sm:$0xff]   ;;  %v6348_v56 = vld [vmem:[%s9141_s1 + $0x6a0] ss:$8 sps:$4 sm:$0xff]  }
  0xa4   :  { %3950 = vmatprep.mubr.bf16.mxu0 %v6248_v57  ;;  %v6366_v57 = vld [vmem:[%s9141_s1 + $0x290] ss:$8 sps:$4 sm:$0xff]  }
  0xaa   :  { %3307 = vmatmul.mubr.bf16.vlgmr.msra.gmra.mrb[0].mxu1 %v6243_v58  ;;  %v6365_v58 = vld [vmem:[%s9141_s1 + $0x6b4] ss:$8 sps:$4 sm:$0xff]  }
  0xab   :  { %3951 = vmatmul.mubr.bf16.vlgmr.msra.gmra.mrb[0].mxu0 %v6246_v59  ;;  %3316 = vmatprep.mubr.bf16.mxu1 %v6252_v61  ;;  %v6379_v59 = vld [vmem:[%s9141_s1 + $0x2a4] ss:$8 sps:$4 sm:$0xff]   ;;  %v6316_v61 = vld [vmem:[%s9142_s0 + $0x368] ss:$72 sps:$4 sm:$0xff]  }
  0xac   :  { %4080 = vmatpush1.bf16.msra.mxu0 %v6249_v60  ;;  %3960 = vmatprep.mubr.bf16.mxu0 %v6254_v62  ;;  %v6363_v60 = vld [vmem:[%s9141_s1 + $0x6b0] ss:$8 sps:$4 sm:$0xff]  }
  0xad   :  { %4081 = vmatprep.subr.bf16.mxu0 %v6258_v63  ;;  %3436 = vmatpush1.bf16.msra.mxu1 %v6284_v0  ;;  %v6317_v62 = vld [vmem:[%s9142_s0 + $0x388] ss:$72 sps:$4 sm:$0xff]   ;;  %v6324_v0 = vld [vmem:[%s9142_s0 + $0x3fc] ss:$72 sps:$4 sm:$0xff]  }
  0xae   :  { %3437 = vmatprep.subr.bf16.mxu1 %v6296_v1  ;;  %v6377_v63 = vld [vmem:[%s9141_s1 + $0x2a0] ss:$8 sps:$4 sm:$0xff]   ;;  %v6371_v1 = vld [vmem:[%s9141_s1 + $0x6c4] ss:$8 sps:$4 sm:$0xff]  }
  0xb0   :  { %4082 = vmatpush1.bf16.msra.mxu0 %v6256_v2  ;;  %v6383_v2 = vld [vmem:[%s9141_s1 + $0x2b4] ss:$8 sps:$4 sm:$0xff]  }
  0xb1   :  { %4083 = vmatprep.subr.bf16.mxu0 %v6263_v5  ;;  %3438 = vmatpush1.bf16.msra.mxu1 %v6294_v6  ;;  %v6381_v5 = vld [vmem:[%s9141_s1 + $0x2b0] ss:$8 sps:$4 sm:$0xff]   ;;  %v6386_v6 = vld [vmem:[%s9141_s1 + $0x6d4] ss:$8 sps:$4 sm:$0xff]  }
  0xb2   :  { %3317 = vmatmul.mubr.bf16.gmra.mrb[4].mxu1 %v6259_v3  ;;  %3439 = vmatprep.subr.bf16.mxu1 %v6308_v11  ;;  %v6326_v3 = vld [vmem:[%s9142_s0 + $0x41c] ss:$72 sps:$4 sm:$0xff]   ;;  %v6392_v11 = vld [vmem:[%s9141_s1 + $0x2c0] ss:$8 sps:$4 sm:$0xff]  }
  0xb3   :  { %3961 = vmatmul.mubr.bf16.gmra.mrb[4].mxu0 %v6260_v4  ;;  %3326 = vmatprep.mubr.bf16.mxu1 %v6264_v8  ;;  %v6369_v4 = vld [vmem:[%s9141_s1 + $0x6c0] ss:$8 sps:$4 sm:$0xff]   ;;  %v6384_v8 = vld [vmem:[%s9141_s1 + $0x6d0] ss:$8 sps:$4 sm:$0xff]  }
  0xb4   :  { %4084 = vmatpush1.bf16.msra.mxu0 %v6261_v7  ;;  %3970 = vmatprep.mubr.bf16.mxu0 %v6266_v9  ;;  %v6394_v7 = vld [vmem:[%s9141_s1 + $0x2c4] ss:$8 sps:$4 sm:$0xff]   ;;  %v6328_v9 = vld [vmem:[%s9142_s0 + $0x3f8] ss:$72 sps:$4 sm:$0xff]  }
  0xb5   :  { %4085 = vmatprep.subr.bf16.mxu0 %v6272_v10  ;;  %3440 = vmatpush1.bf16.msra.mxu1 %v6306_v12  ;;  %v6332_v10 = vld [vmem:[%s9142_s0 + $0x418] ss:$72 sps:$4 sm:$0xff]   ;;  %v6398_v12 = vld [vmem:[%s9141_s1 + $0x6e4] ss:$8 sps:$4 sm:$0xff]  }
  0xb6   :  { %3441 = vmatprep.subr.bf16.mxu1 %v6320_v14  ;;  %v6339_v14 = vld [vmem:[%s9142_s0 + $0x48c] ss:$72 sps:$4 sm:$0xff]  }
  0xb8   :  { %4086 = vmatpush1.bf16.msra.mxu0 %v6270_v13  ;;  %v6401_v13 = vld [vmem:[%s9141_s1 + $0x2d4] ss:$8 sps:$4 sm:$0xff]  }
  0xb9   :  { %4087 = vmatprep.subr.bf16.mxu0 %v6281_v16  ;;  %3442 = vmatpush1.bf16.msra.mxu1 %v6318_v22  ;;  %v6396_v16 = vld [vmem:[%s9141_s1 + $0x6e0] ss:$8 sps:$4 sm:$0xff]   ;;  %v6414_v22 = vld [vmem:[%s9141_s1 + $0x2f4] ss:$8 sps:$4 sm:$0xff]  }
  0xba   :  { %3327 = vmatmul.mubr.bf16.gmra.mrb[8].mxu1 %v6268_v15  ;;  %3443 = vmatprep.subr.bf16.mxu1 %v6331_v23  ;;  %v6341_v15 = vld [vmem:[%s9142_s0 + $0x4ac] ss:$72 sps:$4 sm:$0xff]  }
  0xbb   :  { %3971 = vmatmul.mubr.bf16.gmra.mrb[8].mxu0 %v6269_v17  ;;  %3336 = vmatprep.mubr.bf16.mxu1 %v6273_v18  ;;  %v6399_v17 = vld [vmem:[%s9141_s1 + $0x2d0] ss:$8 sps:$4 sm:$0xff]   ;;  %v6407_v18 = vld [vmem:[%s9141_s1 + $0x2e4] ss:$8 sps:$4 sm:$0xff]  }
  0xbc   :  { %3980 = vmatprep.mubr.bf16.mxu0 %v6275_v19  ;;  %4088 = vmatpush1.bf16.msra.mxu0 %v6279_v20  ;;  %v6411_v19 = vld [vmem:[%s9141_s1 + $0x6f4] ss:$8 sps:$4 sm:$0xff]   ;;  %v6405_v20 = vld [vmem:[%s9141_s1 + $0x2e0] ss:$8 sps:$4 sm:$0xff]   ;;  %v6423_v23 = vld [vmem:[%s9141_s1 + $0x704] ss:$8 sps:$4 sm:$0xff]  }
  0xbd   :  { %4089 = vmatprep.subr.bf16.mxu0 %v6293_v21  ;;  %3444 = vmatpush1.bf16.msra.mxu1 %v6329_v27  ;;  %v6409_v21 = vld [vmem:[%s9141_s1 + $0x6f0] ss:$8 sps:$4 sm:$0xff]   ;;  %v6356_v27 = vld [vmem:[%s9142_s0 + $0x53c] ss:$72 sps:$4 sm:$0xff]  }
  0xbe   :  { %3445 = vmatprep.subr.bf16.mxu1 %v6338_v29  ;;  %v6458_v29 = vld [vmem:[%s9141_s1 + $0x304] ss:$8 sps:$4 sm:$0xff]  }
  0xc0   :  { %4090 = vmatpush1.bf16.msra.mxu0 %v6291_v24  ;;  %v6343_v24 = vld [vmem:[%s9142_s0 + $0x488] ss:$72 sps:$4 sm:$0xff]  }
  0xc1   :  { %4091 = vmatprep.subr.bf16.mxu0 %v6303_v28  ;;  %3446 = vmatpush1.bf16.msra.mxu1 %v6336_v33  ;;  %v6412_v28 = vld [vmem:[%s9141_s1 + $0x2f0] ss:$8 sps:$4 sm:$0xff]   ;;  %v6374_v33 = vld [vmem:[%s9142_s0 + $0x5cc] ss:$72 sps:$4 sm:$0xff]  }
  0xc2   :  { %3337 = vmatmul.mubr.bf16.gmra.mrb[12].mxu1 %v6277_v25  ;;  %3447 = vmatprep.subr.bf16.mxu1 %v6346_v35  ;;  %v6347_v25 = vld [vmem:[%s9142_s0 + $0x4a8] ss:$72 sps:$4 sm:$0xff]  }
  0xc3   :  { %3981 = vmatmul.mubr.bf16.gmra.mrb[12].mxu0 %v6278_v26  ;;  %3346 = vmatprep.mubr.bf16.mxu1 %v6282_v30  ;;  %v6354_v26 = vld [vmem:[%s9142_s0 + $0x51c] ss:$72 sps:$4 sm:$0xff]   ;;  %v6358_v30 = vld [vmem:[%s9142_s0 + $0x518] ss:$72 sps:$4 sm:$0xff]   ;;  %v6380_v35 = vld [vmem:[%s9142_s0 + $0x5c8] ss:$72 sps:$4 sm:$0xff]  }
  0xc4   :  { %3990 = vmatprep.mubr.bf16.mxu0 %v6287_v31  ;;  %4092 = vmatpush1.bf16.msra.mxu0 %v6301_v32  ;;  %v6362_v31 = vld [vmem:[%s9142_s0 + $0x538] ss:$72 sps:$4 sm:$0xff]   ;;  %v6372_v32 = vld [vmem:[%s9142_s0 + $0x5ac] ss:$72 sps:$4 sm:$0xff]  }
  0xc5   :  { %4093 = vmatprep.subr.bf16.mxu0 %v6311_v34  ;;  %3448 = vmatpush1.bf16.msra.mxu1 %v6344_v39  ;;  %v6376_v34 = vld [vmem:[%s9142_s0 + $0x5a8] ss:$72 sps:$4 sm:$0xff]  }
  0xc6   :  { %3449 = vmatprep.subr.bf16.mxu1 %v6353_v40  ;;  %v238_v39 = vld [vmem:[%s9142_s0 + $0x6e8] sm:$0x33]  ;;  %v6391_v40 = vld [vmem:[%s9142_s0 + $0x638] ss:$72 sps:$4 sm:$0xff]  }
  0xc8   :  { %4094 = vmatpush1.bf16.msra.mxu0 %v6309_v36  ;;  %v6387_v36 = vld [vmem:[%s9142_s0 + $0x63c] ss:$72 sps:$4 sm:$0xff]  }
  0xc9   :  { %4095 = vmatprep.subr.bf16.mxu0 %v6323_v37  ;;  %3450 = vmatpush1.bf16.msra.mxu1 %v6351_v45  ;;  %v6389_v37 = vld [vmem:[%s9142_s0 + $0x65c] ss:$72 sps:$4 sm:$0xff]   ;;  %v5234_v45 = vcombine.low %v238_v39, %v238_v39 }
  0xca   :  { %3347 = vmatmul.mubr.bf16.gmra.mrb[16].mxu1 %v6289_v38  ;;  %3451 = vmatprep.subr.bf16.mxu1 %v6361_v47  ;;  %v234_v38 = vld [vmem:[%s9142_s0 + $0x6c8] sm:$0x33]  ;;  %v6420_v47 = vld [vmem:[%s9142_s0 + $0x34] ss:$72 sps:$4 sm:$0xff]  }
  0xcb   :  { %3991 = vmatmul.mubr.bf16.gmra.mrb[16].mxu0 %v6290_v41  ;;  %3356 = vmatprep.mubr.bf16.mxu1 %v6297_v42  ;;  %v6395_v41 = vld [vmem:[%s9142_s0 + $0x658] ss:$72 sps:$4 sm:$0xff]   ;;  %v5227_v42 = vcombine.high %v234_v38, %v234_v38 }
  0xcc   :  { %4000 = vmatprep.mubr.bf16.mxu0 %v6299_v43  ;;  %4096 = vmatpush1.bf16.msra.mxu0 %v6321_v44  ;;  %v5235_v43 = vcombine.high %v238_v39, %v238_v39  ;;  %v5226_v44 = vcombine.low %v234_v38, %v234_v38  ;;  %v6505_v38 = vld [vmem:[%s9141_s1 + $0x790] ss:$8 sps:$4 sm:$0xff]   ;;  %v6522_v39 = vld [vmem:[%s9141_s1 + $0x7a4] ss:$8 sps:$4 sm:$0xff]  }
  0xcd   :  { %4097 = vmatprep.subr.bf16.mxu0 %v6335_v46  ;;  %3452 = vmatpush1.bf16.msra.mxu1 %v6359_v51  ;;  %v6417_v46 = vld [vmem:[%s9142_s0 + $0x14] ss:$72 sps:$4 sm:$0xff]   ;;  %v6424_v51 = vld [vmem:[%s9142_s0 + $0xa4] ss:$72 sps:$4 sm:$0xff]  }
  0xce   :  { %3453 = vmatprep.subr.bf16.mxu1 %v6368_v53  ;;  %v6430_v53 = vld [vmem:[%s9141_s1 + $0x714] ss:$8 sps:$4 sm:$0xff]  }
  0xd0   :  { %4098 = vmatpush1.bf16.msra.mxu0 %v6333_v48  ;;  %v6415_v48 = vld [vmem:[%s9142_s0 + $0x10] ss:$72 sps:$4 sm:$0xff]  }
  0xd1   :  { %4099 = vmatprep.subr.bf16.mxu0 %v6350_v52  ;;  %3454 = vmatpush1.bf16.msra.mxu1 %v6366_v57  ;;  %v6426_v52 = vld [vmem:[%s9142_s0 + $0xc4] ss:$72 sps:$4 sm:$0xff]   ;;  %v6431_v57 = vld [vmem:[%s9142_s0 + $0xa0] ss:$72 sps:$4 sm:$0xff]  }
  0xd2   :  { %3357 = vmatmul.mubr.bf16.gmra.mrb[20].mxu1 %v6304_v49  ;;  %3455 = vmatprep.subr.bf16.mxu1 %v6379_v59  ;;  %v6418_v49 = vld [vmem:[%s9142_s0 + $0x30] ss:$72 sps:$4 sm:$0xff]  }
  0xd3   :  { %4001 = vmatmul.mubr.bf16.gmra.mrb[20].mxu0 %v6305_v50  ;;  %3366 = vmatprep.mubr.bf16.mxu1 %v6312_v54  ;;  %v6421_v50 = vld [vmem:[%s9141_s1 + $0x700] ss:$8 sps:$4 sm:$0xff]   ;;  %v6466_v59 = vld [vmem:[%s9141_s1 + $0x310] ss:$8 sps:$4 sm:$0xff]  }
  0xd4   :  { %4010 = vmatprep.mubr.bf16.mxu0 %v6314_v55  ;;  %4100 = vmatpush1.bf16.msra.mxu0 %v6348_v56  ;;  %v6456_v54 = vld [vmem:[%s9141_s1 + $0x300] ss:$8 sps:$4 sm:$0xff]   ;;  %v6468_v55 = vld [vmem:[%s9141_s1 + $0x314] ss:$8 sps:$4 sm:$0xff]   ;;  %v6428_v56 = vld [vmem:[%s9141_s1 + $0x710] ss:$8 sps:$4 sm:$0xff]  }
  0xd5   :  { %4101 = vmatprep.subr.bf16.mxu0 %v6365_v58  ;;  %3456 = vmatpush1.bf16.msra.mxu1 %v6377_v63  ;;  %v6435_v58 = vld [vmem:[%s9141_s1 + $0x724] ss:$8 sps:$4 sm:$0xff]   ;;  %v6438_v63 = vld [vmem:[%s9142_s0 + $0x154] ss:$72 sps:$4 sm:$0xff]  }
  0xd6   :  { %3457 = vmatprep.subr.bf16.mxu1 %v6383_v2  ;;  %v6478_v2 = vld [vmem:[%s9141_s1 + $0x320] ss:$8 sps:$4 sm:$0xff]  }
  0xd8   :  { %4102 = vmatpush1.bf16.msra.mxu0 %v6363_v60  ;;  %v6432_v60 = vld [vmem:[%s9142_s0 + $0xc0] ss:$72 sps:$4 sm:$0xff]  }
  0xd9   :  { %4103 = vmatprep.subr.bf16.mxu0 %v6371_v1  ;;  %3458 = vmatpush1.bf16.msra.mxu1 %v6381_v5  ;;  %v6480_v1 = vld [vmem:[%s9141_s1 + $0x324] ss:$8 sps:$4 sm:$0xff]   ;;  %v6440_v5 = vld [vmem:[%s9142_s0 + $0x130] ss:$72 sps:$4 sm:$0xff]  }
  0xda   :  { %3367 = vmatmul.mubr.bf16.gmra.mrb[24].mxu1 %v6316_v61  ;;  %3459 = vmatprep.subr.bf16.mxu1 %v6394_v7  ;;  %v6433_v61 = vld [vmem:[%s9141_s1 + $0x720] ss:$8 sps:$4 sm:$0xff]   ;;  %v6441_v7 = vld [vmem:[%s9142_s0 + $0x150] ss:$72 sps:$4 sm:$0xff]  }
  0xdb   :  { %4011 = vmatmul.mubr.bf16.gmra.mrb[24].mxu0 %v6317_v62  ;;  %3376 = vmatprep.mubr.bf16.mxu1 %v6324_v0  ;;  %v6436_v62 = vld [vmem:[%s9142_s0 + $0x134] ss:$72 sps:$4 sm:$0xff]  }
  0xdc   :  { %4020 = vmatprep.mubr.bf16.mxu0 %v6326_v3  ;;  %4104 = vmatpush1.bf16.msra.mxu0 %v6369_v4  ;;  %v6444_v0 = vld [vmem:[%s9141_s1 + $0x734] ss:$8 sps:$4 sm:$0xff]   ;;  %v6442_v3 = vld [vmem:[%s9141_s1 + $0x730] ss:$8 sps:$4 sm:$0xff]  }
  0xdd   :  { %4105 = vmatprep.subr.bf16.mxu0 %v6386_v6  ;;  %3460 = vmatpush1.bf16.msra.mxu1 %v6392_v11  ;;  %v6492_v4 = vld [vmem:[%s9141_s1 + $0x334] ss:$8 sps:$4 sm:$0xff]   ;;  %v6453_v6 = vld [vmem:[%s9141_s1 + $0x744] ss:$8 sps:$4 sm:$0xff]  }
  0xde   :  { %3461 = vmatprep.subr.bf16.mxu1 %v6401_v13  ;;  %v6465_v11 = vld [vmem:[%s9141_s1 + $0x754] ss:$8 sps:$4 sm:$0xff]   ;;  %v6503_v13 = vld [vmem:[%s9141_s1 + $0x344] ss:$8 sps:$4 sm:$0xff]  }
  0xe0   :  { %4106 = vmatpush1.bf16.msra.mxu0 %v6384_v8  ;;  %v6445_v8 = vld [vmem:[%s9142_s0 + $0x1c4] ss:$72 sps:$4 sm:$0xff]  }
  0xe1   :  { %4107 = vmatprep.subr.bf16.mxu0 %v6398_v12  ;;  %3462 = vmatpush1.bf16.msra.mxu1 %v6399_v17  ;;  %v6490_v12 = vld [vmem:[%s9141_s1 + $0x330] ss:$8 sps:$4 sm:$0xff]   ;;  %v6475_v17 = vld [vmem:[%s9141_s1 + $0x764] ss:$8 sps:$4 sm:$0xff]  }
  0xe2   :  { %3377 = vmatmul.mubr.bf16.gmra.mrb[28].mxu1 %v6328_v9  ;;  %3463 = vmatprep.subr.bf16.mxu1 %v6407_v18  ;;  %v6447_v9 = vld [vmem:[%s9142_s0 + $0x1e4] ss:$72 sps:$4 sm:$0xff]   ;;  %v6501_v18 = vld [vmem:[%s9141_s1 + $0x340] ss:$8 sps:$4 sm:$0xff]  }
  0xe3   :  { %4021 = vmatmul.mubr.bf16.gmra.mrb[28].mxu0 %v6332_v10  ;;  %3386 = vmatprep.mubr.bf16.mxu1 %v6339_v14  ;;  %v6451_v10 = vld [vmem:[%s9141_s1 + $0x740] ss:$8 sps:$4 sm:$0xff]  }
  0xe4   :  { %4030 = vmatprep.mubr.bf16.mxu0 %v6341_v15  ;;  %4108 = vmatpush1.bf16.msra.mxu0 %v6396_v16  ;;  %v6449_v14 = vld [vmem:[%s9142_s0 + $0x1c0] ss:$72 sps:$4 sm:$0xff]   ;;  %v6463_v16 = vld [vmem:[%s9141_s1 + $0x750] ss:$8 sps:$4 sm:$0xff]  }
  0xe5   :  { %4109 = vmatprep.subr.bf16.mxu0 %v6411_v19  ;;  %3464 = vmatpush1.bf16.msra.mxu1 %v6405_v20  ;;  %v6450_v15 = vld [vmem:[%s9142_s0 + $0x1e0] ss:$72 sps:$4 sm:$0xff]   ;;  %v6454_v19 = vld [vmem:[%s9142_s0 + $0x254] ss:$72 sps:$4 sm:$0xff]  }
  0xe6   :  { %3465 = vmatprep.subr.bf16.mxu1 %v6414_v22  ;;  %v6510_v20 = vld [vmem:[%s9141_s1 + $0x354] ss:$8 sps:$4 sm:$0xff]   ;;  %v6473_v22 = vld [vmem:[%s9141_s1 + $0x760] ss:$8 sps:$4 sm:$0xff]  }
  0xe8   :  { %4110 = vmatpush1.bf16.msra.mxu0 %v6409_v21  ;;  %v6459_v21 = vld [vmem:[%s9142_s0 + $0x274] ss:$72 sps:$4 sm:$0xff]  }
  0xe9   :  { %4240 = vmatprep.subr.bf16.mxu0 %v6423_v23  ;;  %3466 = vmatpush1.bf16.msra.mxu1 %v6412_v28  ;;  %v6483_v23 = vld [vmem:[%s9141_s1 + $0x774] ss:$8 sps:$4 sm:$0xff]   ;;  %v6461_v28 = vld [vmem:[%s9142_s0 + $0x250] ss:$72 sps:$4 sm:$0xff]  }
  0xea   :  { %3387 = vmatmul.mubr.bf16.gmra.mrb[32].mxu1 %v6343_v24  ;;  %3596 = vmatprep.subr.bf16.mxu1 %v6458_v29  ;;  %v6508_v24 = vld [vmem:[%s9141_s1 + $0x350] ss:$8 sps:$4 sm:$0xff]  }
  0xeb   :  { %4031 = vmatmul.mubr.bf16.gmra.mrb[32].mxu0 %v6347_v25  ;;  %3396 = vmatprep.mubr.bf16.mxu1 %v6354_v26  ;;  %v6518_v25 = vld [vmem:[%s9141_s1 + $0x364] ss:$8 sps:$4 sm:$0xff]   ;;  %v6481_v26 = vld [vmem:[%s9141_s1 + $0x770] ss:$8 sps:$4 sm:$0xff]  }
  0xec   :  { %4040 = vmatprep.mubr.bf16.mxu0 %v6356_v27  ;;  %v6495_v27 = vld [vmem:[%s9141_s1 + $0x784] ss:$8 sps:$4 sm:$0xff]   ;;  %v6462_v29 = vld [vmem:[%s9142_s0 + $0x270] ss:$72 sps:$4 sm:$0xff]  }
  0xf2   :  { %3397 = vmatmul.mubr.bf16.gmra.mrb[36].mxu1 %v6358_v30  ;;  %v6516_v30 = vld [vmem:[%s9141_s1 + $0x360] ss:$8 sps:$4 sm:$0xff]  }
  0xf3   :  { %4041 = vmatmul.mubr.bf16.gmra.mrb[36].mxu0 %v6362_v31  ;;  %3406 = vmatprep.mubr.bf16.mxu1 %v6372_v32  ;;  %v6525_v31 = vld [vmem:[%s9141_s1 + $0x374] ss:$8 sps:$4 sm:$0xff]   ;;  %v6469_v32 = vld [vmem:[%s9142_s0 + $0x2e4] ss:$72 sps:$4 sm:$0xff]  }
  0xf4   :  { %4050 = vmatprep.mubr.bf16.mxu0 %v6374_v33  ;;  %v6471_v33 = vld [vmem:[%s9142_s0 + $0x304] ss:$72 sps:$4 sm:$0xff]  }
  0xfa   :  { %3407 = vmatmul.mubr.bf16.gmra.mrb[40].mxu1 %v6376_v34  ;;  %v6493_v34 = vld [vmem:[%s9141_s1 + $0x780] ss:$8 sps:$4 sm:$0xff]  }
  0xfb   :  { %4051 = vmatmul.mubr.bf16.gmra.mrb[40].mxu0 %v6380_v35  ;;  %3416 = vmatprep.mubr.bf16.mxu1 %v6387_v36  ;;  %v6523_v35 = vld [vmem:[%s9141_s1 + $0x370] ss:$8 sps:$4 sm:$0xff]   ;;  %v6507_v36 = vld [vmem:[%s9141_s1 + $0x794] ss:$8 sps:$4 sm:$0xff]  }
  0xfc   :  { %4060 = vmatprep.mubr.bf16.mxu0 %v6389_v37  ;;  %v6533_v37 = vld [vmem:[%s9141_s1 + $0x384] ss:$8 sps:$4 sm:$0xff]  }
 0x102   :  { %3417 = vmatmul.mubr.bf16.gmra.mrb[44].mxu1 %v6391_v40  ;;  %v6531_v40 = vld [vmem:[%s9141_s1 + $0x380] ss:$8 sps:$4 sm:$0xff]  }
 0x103   :  { %4061 = vmatmul.mubr.bf16.gmra.mrb[44].mxu0 %v6395_v41  ;;  %3426 = vmatprep.mubr.bf16.mxu1 %v5227_v42  ;;  %v6540_v41 = vld [vmem:[%s9141_s1 + $0x394] ss:$8 sps:$4 sm:$0xff]   ;;  %v6476_v42 = vld [vmem:[%s9142_s0 + $0x2e0] ss:$72 sps:$4 sm:$0xff]  }
 0x104   :  { %4070 = vmatprep.mubr.bf16.mxu0 %v5235_v43  ;;  %v6477_v43 = vld [vmem:[%s9142_s0 + $0x300] ss:$72 sps:$4 sm:$0xff]  }
 0x10a   :  { %3427 = vmatmul.mubr.bf16.gmra.mrb[48].mxu1 %v5226_v44  ;;  %v6484_v44 = vld [vmem:[%s9142_s0 + $0x374] ss:$72 sps:$4 sm:$0xff]  }
 0x10b   :  { %4071 = vmatmul.mubr.bf16.gmra.mrb[48].mxu0 %v5234_v45  ;;  %3467 = vmatprep.mubr.bf16.mxu1 %v6417_v46  ;;  %v6486_v45 = vld [vmem:[%s9142_s0 + $0x394] ss:$72 sps:$4 sm:$0xff]   ;;  %v6520_v46 = vld [vmem:[%s9141_s1 + $0x7a0] ss:$8 sps:$4 sm:$0xff]  }
 0x10c   :  { %4111 = vmatprep.mubr.bf16.mxu0 %v6420_v47  ;;  %v6538_v47 = vld [vmem:[%s9141_s1 + $0x390] ss:$8 sps:$4 sm:$0xff]  }
 0x112   :  { %3468 = vmatmul.mubr.bf16.vlgmr.msra.gmra.mrb[0].mxu1 %v6415_v48  ;;  %v6537_v48 = vld [vmem:[%s9141_s1 + $0x7b4] ss:$8 sps:$4 sm:$0xff]  }
 0x113   :  { %4112 = vmatmul.mubr.bf16.vlgmr.msra.gmra.mrb[0].mxu0 %v6418_v49  ;;  %3477 = vmatprep.mubr.bf16.mxu1 %v6424_v51  ;;  %v6551_v49 = vld [vmem:[%s9141_s1 + $0x3a4] ss:$8 sps:$4 sm:$0xff]  }
 0x114   :  { %4241 = vmatpush1.bf16.msra.mxu0 %v6421_v50  ;;  %4121 = vmatprep.mubr.bf16.mxu0 %v6426_v52  ;;  %v6535_v50 = vld [vmem:[%s9141_s1 + $0x7b0] ss:$8 sps:$4 sm:$0xff]   ;;  %v6543_v51 = vld [vmem:[%s9141_s1 + $0x7c4] ss:$8 sps:$4 sm:$0xff]   ;;  %v6549_v52 = vld [vmem:[%s9141_s1 + $0x3a0] ss:$8 sps:$4 sm:$0xff]  }
 0x115   :  { %4242 = vmatprep.subr.bf16.mxu0 %v6430_v53  ;;  %3597 = vmatpush1.bf16.msra.mxu1 %v6456_v54  ;;  %v6555_v53 = vld [vmem:[%s9141_s1 + $0x3b4] ss:$8 sps:$4 sm:$0xff]   ;;  %v6488_v54 = vld [vmem:[%s9142_s0 + $0x370] ss:$72 sps:$4 sm:$0xff]  }
 0x116   :  { %3598 = vmatprep.subr.bf16.mxu1 %v6468_v55  ;;  %v6489_v55 = vld [vmem:[%s9142_s0 + $0x390] ss:$72 sps:$4 sm:$0xff]  }
 0x118   :  { %4243 = vmatpush1.bf16.msra.mxu0 %v6428_v56  ;;  %v6496_v56 = vld [vmem:[%s9142_s0 + $0x404] ss:$72 sps:$4 sm:$0xff]  }
 0x119   :  { %4244 = vmatprep.subr.bf16.mxu0 %v6435_v58  ;;  %3599 = vmatpush1.bf16.msra.mxu1 %v6466_v59  ;;  %v6541_v58 = vld [vmem:[%s9141_s1 + $0x7c0] ss:$8 sps:$4 sm:$0xff]   ;;  %v6553_v59 = vld [vmem:[%s9141_s1 + $0x3b0] ss:$8 sps:$4 sm:$0xff]  }
 0x11a   :  { %3478 = vmatmul.mubr.bf16.gmra.mrb[4].mxu1 %v6431_v57  ;;  %3600 = vmatprep.subr.bf16.mxu1 %v6480_v1  ;;  %v6498_v57 = vld [vmem:[%s9142_s0 + $0x424] ss:$72 sps:$4 sm:$0xff]   ;;  %v6573_v1 = vld [vmem:[%s9141_s1 + $0x3d4] ss:$8 sps:$4 sm:$0xff]  }
 0x11b   :  { %4122 = vmatmul.mubr.bf16.gmra.mrb[4].mxu0 %v6432_v60  ;;  %3487 = vmatprep.mubr.bf16.mxu1 %v6436_v62  ;;  %v6558_v60 = vld [vmem:[%s9141_s1 + $0x7d4] ss:$8 sps:$4 sm:$0xff]   ;;  %v6556_v62 = vld [vmem:[%s9141_s1 + $0x7d0] ss:$8 sps:$4 sm:$0xff]  }
 0x11c   :  { %4245 = vmatpush1.bf16.msra.mxu0 %v6433_v61  ;;  %4131 = vmatprep.mubr.bf16.mxu0 %v6438_v63  ;;  %v6566_v61 = vld [vmem:[%s9141_s1 + $0x3c4] ss:$8 sps:$4 sm:$0xff]   ;;  %v6564_v63 = vld [vmem:[%s9141_s1 + $0x3c0] ss:$8 sps:$4 sm:$0xff]  }
 0x11d   :  { %4246 = vmatprep.subr.bf16.mxu0 %v6444_v0  ;;  %3601 = vmatpush1.bf16.msra.mxu1 %v6478_v2  ;;  %v6570_v0 = vld [vmem:[%s9141_s1 + $0x7e4] ss:$8 sps:$4 sm:$0xff]   ;;  %v6500_v2 = vld [vmem:[%s9142_s0 + $0x400] ss:$72 sps:$4 sm:$0xff]  }
 0x11e   :  { %3602 = vmatprep.subr.bf16.mxu1 %v6492_v4  ;;  %v6511_v4 = vld [vmem:[%s9142_s0 + $0x494] ss:$72 sps:$4 sm:$0xff]  }
 0x120   :  { %4247 = vmatpush1.bf16.msra.mxu0 %v6442_v3  ;;  %v6504_v3 = vld [vmem:[%s9142_s0 + $0x420] ss:$72 sps:$4 sm:$0xff]  }
 0x121   :  { %4248 = vmatprep.subr.bf16.mxu0 %v6453_v6  ;;  %3603 = vmatpush1.bf16.msra.mxu1 %v6490_v12  ;;  %v6568_v6 = vld [vmem:[%s9141_s1 + $0x7e0] ss:$8 sps:$4 sm:$0xff]   ;;  %v6586_v12 = vld [vmem:[%s9141_s1 + $0x3f4] ss:$8 sps:$4 sm:$0xff]  }
 0x122   :  { %3488 = vmatmul.mubr.bf16.gmra.mrb[8].mxu1 %v6440_v5  ;;  %3604 = vmatprep.subr.bf16.mxu1 %v6503_v13  ;;  %v6513_v5 = vld [vmem:[%s9142_s0 + $0x4b4] ss:$72 sps:$4 sm:$0xff]   ;;  %v6595_v13 = vld [vmem:[%s9141_s1 + $0x804] ss:$8 sps:$4 sm:$0xff]  }
 0x123   :  { %4132 = vmatmul.mubr.bf16.gmra.mrb[8].mxu0 %v6441_v7  ;;  %3497 = vmatprep.mubr.bf16.mxu1 %v6445_v8  ;;  %v6571_v7 = vld [vmem:[%s9141_s1 + $0x3d0] ss:$8 sps:$4 sm:$0xff]   ;;  %v6579_v8 = vld [vmem:[%s9141_s1 + $0x3e4] ss:$8 sps:$4 sm:$0xff]  }
 0x124   :  { %4141 = vmatprep.mubr.bf16.mxu0 %v6447_v9  ;;  %4249 = vmatpush1.bf16.msra.mxu0 %v6451_v10  ;;  %v6583_v9 = vld [vmem:[%s9141_s1 + $0x7f4] ss:$8 sps:$4 sm:$0xff]   ;;  %v6577_v10 = vld [vmem:[%s9141_s1 + $0x3e0] ss:$8 sps:$4 sm:$0xff]  }
 0x125   :  { %4250 = vmatprep.subr.bf16.mxu0 %v6465_v11  ;;  %3605 = vmatpush1.bf16.msra.mxu1 %v6501_v18  ;;  %v6581_v11 = vld [vmem:[%s9141_s1 + $0x7f0] ss:$8 sps:$4 sm:$0xff]  }
 0x126   :  { %3606 = vmatprep.subr.bf16.mxu1 %v6510_v20  ;;  %v6584_v18 = vld [vmem:[%s9141_s1 + $0x3f0] ss:$8 sps:$4 sm:$0xff]   ;;  %v6534_v20 = vld [vmem:[%s9142_s0 + $0x540] ss:$72 sps:$4 sm:$0xff]  }
 0x128   :  { %4251 = vmatpush1.bf16.msra.mxu0 %v6463_v16  ;;  %v6526_v16 = vld [vmem:[%s9142_s0 + $0x524] ss:$72 sps:$4 sm:$0xff]  }
 0x129   :  { %4252 = vmatprep.subr.bf16.mxu0 %v6475_v17  ;;  %3607 = vmatpush1.bf16.msra.mxu1 %v6508_v24  ;;  %v6528_v17 = vld [vmem:[%s9142_s0 + $0x544] ss:$72 sps:$4 sm:$0xff]   ;;  %v6552_v24 = vld [vmem:[%s9142_s0 + $0x5d0] ss:$72 sps:$4 sm:$0xff]  }
 0x12a   :  { %3498 = vmatmul.mubr.bf16.gmra.mrb[12].mxu1 %v6449_v14  ;;  %3608 = vmatprep.subr.bf16.mxu1 %v6518_v25  ;;  %v6515_v14 = vld [vmem:[%s9142_s0 + $0x490] ss:$72 sps:$4 sm:$0xff]   ;;  %v6559_v25 = vld [vmem:[%s9142_s0 + $0x644] ss:$72 sps:$4 sm:$0xff]  }
 0x12b   :  { %4142 = vmatmul.mubr.bf16.gmra.mrb[12].mxu0 %v6450_v15  ;;  %3507 = vmatprep.mubr.bf16.mxu1 %v6454_v19  ;;  %v6519_v15 = vld [vmem:[%s9142_s0 + $0x4b0] ss:$72 sps:$4 sm:$0xff]   ;;  %v6530_v19 = vld [vmem:[%s9142_s0 + $0x520] ss:$72 sps:$4 sm:$0xff]  }
 0x12c   :  { %4151 = vmatprep.mubr.bf16.mxu0 %v6459_v21  ;;  %4253 = vmatpush1.bf16.msra.mxu0 %v6473_v22  ;;  %v6544_v21 = vld [vmem:[%s9142_s0 + $0x5b4] ss:$72 sps:$4 sm:$0xff]  }
 0x12d   :  { %4254 = vmatprep.subr.bf16.mxu0 %v6483_v23  ;;  %3609 = vmatpush1.bf16.msra.mxu1 %v6516_v30  ;;  %v6546_v22 = vld [vmem:[%s9142_s0 + $0x5d4] ss:$72 sps:$4 sm:$0xff]   ;;  %v6548_v23 = vld [vmem:[%s9142_s0 + $0x5b0] ss:$72 sps:$4 sm:$0xff]   ;;  %v6567_v30 = vld [vmem:[%s9142_s0 + $0x660] ss:$72 sps:$4 sm:$0xff]  }
 0x12e   :  { %3610 = vmatprep.subr.bf16.mxu1 %v6525_v31 }
 0x130   :  { %4255 = vmatpush1.bf16.msra.mxu0 %v6481_v26  ;;  %v6561_v26 = vld [vmem:[%s9142_s0 + $0x664] ss:$72 sps:$4 sm:$0xff]  }
 0x131   :  { %4256 = vmatprep.subr.bf16.mxu0 %v6495_v27  ;;  %3611 = vmatpush1.bf16.msra.mxu1 %v6523_v35  ;;  %v235_v27 = vld [vmem:[%s9142_s0 + $0x6d0] sm:$0x33]  ;;  %v6589_v35 = vld [vmem:[%s9142_s0 + $0x1c] ss:$72 sps:$4 sm:$0xff]  }
 0x132   :  { %3508 = vmatmul.mubr.bf16.gmra.mrb[16].mxu1 %v6461_v28  ;;  %3612 = vmatprep.subr.bf16.mxu1 %v6533_v37  ;;  %v239_v28 = vld [vmem:[%s9142_s0 + $0x6f0] sm:$0x33]  ;;  %v5229_v31 = vcombine.high %v235_v27, %v235_v27  ;;  %v6587_v37 = vld [vmem:[%s9142_s0 + $0x18] ss:$72 sps:$4 sm:$0xff]  }
 0x133   :  { %4152 = vmatmul.mubr.bf16.gmra.mrb[16].mxu0 %v6462_v29  ;;  %3517 = vmatprep.mubr.bf16.mxu1 %v6469_v32  ;;  %v6563_v29 = vld [vmem:[%s9142_s0 + $0x640] ss:$72 sps:$4 sm:$0xff]   ;;  %v5237_v32 = vcombine.high %v239_v28, %v239_v28 }
 0x134   :  { %4161 = vmatprep.mubr.bf16.mxu0 %v6471_v33  ;;  %4257 = vmatpush1.bf16.msra.mxu0 %v6493_v34  ;;  %v5228_v33 = vcombine.low %v235_v27, %v235_v27  ;;  %v5236_v34 = vcombine.low %v239_v28, %v239_v28  ;;  %v6692_v27 = vld [vmem:[%s9141_s1 + $0x8d0] ss:$8 sps:$4 sm:$0xff]   ;;  %v6703_v28 = vld [vmem:[%s9141_s1 + $0x8e4] ss:$8 sps:$4 sm:$0xff]  }
 0x135   :  { %4258 = vmatprep.subr.bf16.mxu0 %v6507_v36  ;;  %3613 = vmatpush1.bf16.msra.mxu1 %v6531_v40  ;;  %v6592_v36 = vld [vmem:[%s9142_s0 + $0x3c] ss:$72 sps:$4 sm:$0xff]   ;;  %v6596_v40 = vld [vmem:[%s9142_s0 + $0xac] ss:$72 sps:$4 sm:$0xff]  }
 0x136   :  { %3614 = vmatprep.subr.bf16.mxu1 %v6540_v41  ;;  %v6598_v41 = vld [vmem:[%s9142_s0 + $0xcc] ss:$72 sps:$4 sm:$0xff]  }
 0x138   :  { %4259 = vmatpush1.bf16.msra.mxu0 %v6505_v38  ;;  %v6590_v38 = vld [vmem:[%s9142_s0 + $0x38] ss:$72 sps:$4 sm:$0xff]  }
 0x139   :  { %4260 = vmatprep.subr.bf16.mxu0 %v6522_v39  ;;  %3615 = vmatpush1.bf16.msra.mxu1 %v6538_v47  ;;  %v6593_v39 = vld [vmem:[%s9141_s1 + $0x800] ss:$8 sps:$4 sm:$0xff]  }
 0x13a   :  { %3518 = vmatmul.mubr.bf16.gmra.mrb[20].mxu1 %v6476_v42  ;;  %3616 = vmatprep.subr.bf16.mxu1 %v6551_v49  ;;  %v6602_v42 = vld [vmem:[%s9141_s1 + $0x814] ss:$8 sps:$4 sm:$0xff]   ;;  %v6605_v47 = vld [vmem:[%s9141_s1 + $0x820] ss:$8 sps:$4 sm:$0xff]  }
 0x13b   :  { %4162 = vmatmul.mubr.bf16.gmra.mrb[20].mxu0 %v6477_v43  ;;  %3527 = vmatprep.mubr.bf16.mxu1 %v6484_v44  ;;  %v6600_v43 = vld [vmem:[%s9141_s1 + $0x810] ss:$8 sps:$4 sm:$0xff]   ;;  %v6607_v44 = vld [vmem:[%s9141_s1 + $0x824] ss:$8 sps:$4 sm:$0xff]  }
 0x13c   :  { %4171 = vmatprep.mubr.bf16.mxu0 %v6486_v45  ;;  %4261 = vmatpush1.bf16.msra.mxu0 %v6520_v46  ;;  %v6603_v45 = vld [vmem:[%s9142_s0 + $0xa8] ss:$72 sps:$4 sm:$0xff]   ;;  %v6610_v49 = vld [vmem:[%s9142_s0 + $0x15c] ss:$72 sps:$4 sm:$0xff]  }
 0x13d   :  { %4262 = vmatprep.subr.bf16.mxu0 %v6537_v48  ;;  %3617 = vmatpush1.bf16.msra.mxu1 %v6549_v52  ;;  %v6604_v46 = vld [vmem:[%s9142_s0 + $0xc8] ss:$72 sps:$4 sm:$0xff]   ;;  %v6608_v48 = vld [vmem:[%s9142_s0 + $0x13c] ss:$72 sps:$4 sm:$0xff]  }
 0x13e   :  { %3618 = vmatprep.subr.bf16.mxu1 %v6555_v53  ;;  %v6625_v52 = vld [vmem:[%s9141_s1 + $0x844] ss:$8 sps:$4 sm:$0xff]   ;;  %v6612_v53 = vld [vmem:[%s9142_s0 + $0x138] ss:$72 sps:$4 sm:$0xff]  }
 0x140   :  { %4263 = vmatpush1.bf16.msra.mxu0 %v6535_v50  ;;  %v6616_v50 = vld [vmem:[%s9141_s1 + $0x834] ss:$8 sps:$4 sm:$0xff]  }
 0x141   :  { %4264 = vmatprep.subr.bf16.mxu0 %v6543_v51  ;;  %3619 = vmatpush1.bf16.msra.mxu1 %v6553_v59  ;;  %v6614_v51 = vld [vmem:[%s9141_s1 + $0x830] ss:$8 sps:$4 sm:$0xff]  }
 0x142   :  { %3528 = vmatmul.mubr.bf16.gmra.mrb[24].mxu1 %v6488_v54  ;;  %3620 = vmatprep.subr.bf16.mxu1 %v6566_v61  ;;  %v6613_v54 = vld [vmem:[%s9142_s0 + $0x158] ss:$72 sps:$4 sm:$0xff]   ;;  %v6621_v61 = vld [vmem:[%s9142_s0 + $0x1c8] ss:$72 sps:$4 sm:$0xff]  }
 0x143   :  { %4172 = vmatmul.mubr.bf16.gmra.mrb[24].mxu0 %v6489_v55  ;;  %3537 = vmatprep.mubr.bf16.mxu1 %v6496_v56  ;;  %v6617_v55 = vld [vmem:[%s9142_s0 + $0x1cc] ss:$72 sps:$4 sm:$0xff]   ;;  %v6632_v59 = vld [vmem:[%s9141_s1 + $0x850] ss:$8 sps:$4 sm:$0xff]  }
 0x144   :  { %4181 = vmatprep.mubr.bf16.mxu0 %v6498_v57  ;;  %4265 = vmatpush1.bf16.msra.mxu0 %v6541_v58  ;;  %v6619_v56 = vld [vmem:[%s9142_s0 + $0x1ec] ss:$72 sps:$4 sm:$0xff]   ;;  %v6623_v57 = vld [vmem:[%s9141_s1 + $0x840] ss:$8 sps:$4 sm:$0xff]  }
 0x145   :  { %4266 = vmatprep.subr.bf16.mxu0 %v6558_v60  ;;  %3621 = vmatpush1.bf16.msra.mxu1 %v6564_v63  ;;  %v6634_v58 = vld [vmem:[%s9141_s1 + $0x854] ss:$8 sps:$4 sm:$0xff]   ;;  %v6641_v60 = vld [vmem:[%s9141_s1 + $0x864] ss:$8 sps:$4 sm:$0xff]  }
 0x146   :  { %3622 = vmatprep.subr.bf16.mxu1 %v6573_v1  ;;  %v6626_v63 = vld [vmem:[%s9142_s0 + $0x25c] ss:$72 sps:$4 sm:$0xff]   ;;  %v6639_v1 = vld [vmem:[%s9141_s1 + $0x860] ss:$8 sps:$4 sm:$0xff]  }
 0x148   :  { %4267 = vmatpush1.bf16.msra.mxu0 %v6556_v62  ;;  %v6622_v62 = vld [vmem:[%s9142_s0 + $0x1e8] ss:$72 sps:$4 sm:$0xff]  }
 0x149   :  { %4268 = vmatprep.subr.bf16.mxu0 %v6570_v0  ;;  %3623 = vmatpush1.bf16.msra.mxu1 %v6571_v7  ;;  %v6628_v0 = vld [vmem:[%s9142_s0 + $0x27c] ss:$72 sps:$4 sm:$0xff]   ;;  %v6635_v7 = vld [vmem:[%s9142_s0 + $0x2ec] ss:$72 sps:$4 sm:$0xff]  }
 0x14a   :  { %3538 = vmatmul.mubr.bf16.gmra.mrb[28].mxu1 %v6500_v2  ;;  %3624 = vmatprep.subr.bf16.mxu1 %v6579_v8  ;;  %v6646_v2 = vld [vmem:[%s9141_s1 + $0x874] ss:$8 sps:$4 sm:$0xff]  }
 0x14b   :  { %4182 = vmatmul.mubr.bf16.gmra.mrb[28].mxu0 %v6504_v3  ;;  %3547 = vmatprep.mubr.bf16.mxu1 %v6511_v4  ;;  %v6644_v3 = vld [vmem:[%s9141_s1 + $0x870] ss:$8 sps:$4 sm:$0xff]   ;;  %v6655_v4 = vld [vmem:[%s9141_s1 + $0x884] ss:$8 sps:$4 sm:$0xff]  }
 0x14c   :  { %4191 = vmatprep.mubr.bf16.mxu0 %v6513_v5  ;;  %4269 = vmatpush1.bf16.msra.mxu0 %v6568_v6  ;;  %v6630_v5 = vld [vmem:[%s9142_s0 + $0x258] ss:$72 sps:$4 sm:$0xff]   ;;  %v6637_v8 = vld [vmem:[%s9142_s0 + $0x30c] ss:$72 sps:$4 sm:$0xff]  }
 0x14d   :  { %4270 = vmatprep.subr.bf16.mxu0 %v6583_v9  ;;  %3625 = vmatpush1.bf16.msra.mxu1 %v6577_v10  ;;  %v6631_v6 = vld [vmem:[%s9142_s0 + $0x278] ss:$72 sps:$4 sm:$0xff]   ;;  %v6664_v10 = vld [vmem:[%s9141_s1 + $0x894] ss:$8 sps:$4 sm:$0xff]  }
 0x14e   :  { %3626 = vmatprep.subr.bf16.mxu1 %v6586_v12  ;;  %v6653_v9 = vld [vmem:[%s9141_s1 + $0x880] ss:$8 sps:$4 sm:$0xff]   ;;  %v6673_v12 = vld [vmem:[%s9141_s1 + $0x8a4] ss:$8 sps:$4 sm:$0xff]  }
 0x150   :  { %4271 = vmatpush1.bf16.msra.mxu0 %v6581_v11  ;;  %v6662_v11 = vld [vmem:[%s9141_s1 + $0x890] ss:$8 sps:$4 sm:$0xff]  }
 0x151   :  { %4401 = vmatprep.subr.bf16.mxu0 %v6595_v13  ;;  %3627 = vmatpush1.bf16.msra.mxu1 %v6584_v18  ;;  %v6682_v18 = vld [vmem:[%s9141_s1 + $0x8b4] ss:$8 sps:$4 sm:$0xff]  }
 0x152   :  { %3548 = vmatmul.mubr.bf16.gmra.mrb[32].mxu1 %v6515_v14  ;;  %5530 = vmatprep.subr.bf16.mxu1 %v6595_v13  ;;  %v6642_v13 = vld [vmem:[%s9142_s0 + $0x2e8] ss:$72 sps:$4 sm:$0xff]  }
 0x153   :  { %4192 = vmatmul.mubr.bf16.gmra.mrb[32].mxu0 %v6519_v15  ;;  %3557 = vmatprep.mubr.bf16.mxu1 %v6526_v16  ;;  %v6643_v14 = vld [vmem:[%s9142_s0 + $0x308] ss:$72 sps:$4 sm:$0xff]   ;;  %v6647_v15 = vld [vmem:[%s9142_s0 + $0x37c] ss:$72 sps:$4 sm:$0xff]  }
 0x154   :  { %4201 = vmatprep.mubr.bf16.mxu0 %v6528_v17  ;;  %v6649_v16 = vld [vmem:[%s9142_s0 + $0x39c] ss:$72 sps:$4 sm:$0xff]   ;;  %v6671_v17 = vld [vmem:[%s9141_s1 + $0x8a0] ss:$8 sps:$4 sm:$0xff]  }
 0x15a   :  { %3558 = vmatmul.mubr.bf16.gmra.mrb[36].mxu1 %v6530_v19  ;;  %v6680_v19 = vld [vmem:[%s9141_s1 + $0x8b0] ss:$8 sps:$4 sm:$0xff]  }
 0x15b   :  { %4202 = vmatmul.mubr.bf16.gmra.mrb[36].mxu0 %v6534_v20  ;;  %3567 = vmatprep.mubr.bf16.mxu1 %v6544_v21  ;;  %v6685_v20 = vld [vmem:[%s9141_s1 + $0x8c4] ss:$8 sps:$4 sm:$0xff]   ;;  %v6651_v21 = vld [vmem:[%s9142_s0 + $0x378] ss:$72 sps:$4 sm:$0xff]  }
 0x15c   :  { %4211 = vmatprep.mubr.bf16.mxu0 %v6546_v22  ;;  %v6652_v22 = vld [vmem:[%s9142_s0 + $0x398] ss:$72 sps:$4 sm:$0xff]  }
 0x162   :  { %3568 = vmatmul.mubr.bf16.gmra.mrb[40].mxu1 %v6548_v23  ;;  %v6656_v23 = vld [vmem:[%s9142_s0 + $0x40c] ss:$72 sps:$4 sm:$0xff]  }
 0x163   :  { %4212 = vmatmul.mubr.bf16.gmra.mrb[40].mxu0 %v6552_v24  ;;  %3577 = vmatprep.mubr.bf16.mxu1 %v6559_v25  ;;  %v6658_v24 = vld [vmem:[%s9142_s0 + $0x42c] ss:$72 sps:$4 sm:$0xff]   ;;  %v6683_v25 = vld [vmem:[%s9141_s1 + $0x8c0] ss:$8 sps:$4 sm:$0xff]  }
 0x164   :  { %4221 = vmatprep.mubr.bf16.mxu0 %v6561_v26  ;;  %v6694_v26 = vld [vmem:[%s9141_s1 + $0x8d4] ss:$8 sps:$4 sm:$0xff]  }
 0x16a   :  { %3578 = vmatmul.mubr.bf16.gmra.mrb[44].mxu1 %v6563_v29  ;;  %v6660_v29 = vld [vmem:[%s9142_s0 + $0x408] ss:$72 sps:$4 sm:$0xff]  }
 0x16b   :  { %4222 = vmatmul.mubr.bf16.gmra.mrb[44].mxu0 %v6567_v30  ;;  %3587 = vmatprep.mubr.bf16.mxu1 %v5229_v31  ;;  %v6661_v30 = vld [vmem:[%s9142_s0 + $0x428] ss:$72 sps:$4 sm:$0xff]   ;;  %v6665_v31 = vld [vmem:[%s9142_s0 + $0x49c] ss:$72 sps:$4 sm:$0xff]  }
 0x16c   :  { %4231 = vmatprep.mubr.bf16.mxu0 %v5237_v32  ;;  %v6667_v32 = vld [vmem:[%s9142_s0 + $0x4bc] ss:$72 sps:$4 sm:$0xff]  }
 0x172   :  { %3588 = vmatmul.mubr.bf16.gmra.mrb[48].mxu1 %v5228_v33  ;;  %v6701_v33 = vld [vmem:[%s9141_s1 + $0x8e0] ss:$8 sps:$4 sm:$0xff]  }
 0x173   :  { %4232 = vmatmul.mubr.bf16.gmra.mrb[48].mxu0 %v5236_v34  ;;  %3628 = vmatprep.mubr.bf16.mxu1 %v6589_v35  ;;  %v6710_v34 = vld [vmem:[%s9141_s1 + $0x8f4] ss:$8 sps:$4 sm:$0xff]   ;;  %v6708_v35 = vld [vmem:[%s9141_s1 + $0x8f0] ss:$8 sps:$4 sm:$0xff]  }
 0x174   :  { %4272 = vmatprep.mubr.bf16.mxu0 %v6592_v36  ;;  %v6669_v36 = vld [vmem:[%s9142_s0 + $0x498] ss:$72 sps:$4 sm:$0xff]  }
 0x17a   :  { %3629 = vmatmul.mubr.bf16.vlgmr.msra.gmra.mrb[0].mxu1 %v6587_v37  ;;  %v6670_v37 = vld [vmem:[%s9142_s0 + $0x4b8] ss:$72 sps:$4 sm:$0xff]  }
 0x17b   :  { %4273 = vmatmul.mubr.bf16.vlgmr.msra.gmra.mrb[0].mxu0 %v6590_v38  ;;  %3638 = vmatprep.mubr.bf16.mxu1 %v6596_v40  ;;  %v6674_v38 = vld [vmem:[%s9142_s0 + $0x52c] ss:$72 sps:$4 sm:$0xff]   ;;  %v6678_v40 = vld [vmem:[%s9142_s0 + $0x528] ss:$72 sps:$4 sm:$0xff]  }
 0x17c   :  { %4402 = vmatpush1.bf16.msra.mxu0 %v6593_v39  ;;  %4282 = vmatprep.mubr.bf16.mxu0 %v6598_v41  ;;  %v6679_v41 = vld [vmem:[%s9142_s0 + $0x548] ss:$72 sps:$4 sm:$0xff]  }
 0x17d   :  { %4403 = vmatprep.subr.bf16.mxu0 %v6602_v42  ;;  %5546 = vmatpush1.bf16.msra.mxu1 %v6593_v39  ;;  %v6676_v39 = vld [vmem:[%s9142_s0 + $0x54c] ss:$72 sps:$4 sm:$0xff]  }
 0x17e   :  { %5531 = vmatprep.subr.bf16.mxu1 %v6602_v42  ;;  %v6686_v42 = vld [vmem:[%s9142_s0 + $0x5bc] ss:$72 sps:$4 sm:$0xff]  }
 0x180   :  { %4404 = vmatpush1.bf16.msra.mxu0 %v6600_v43 }
 0x181   :  { %4405 = vmatprep.subr.bf16.mxu0 %v6607_v44  ;;  %5547 = vmatpush1.bf16.msra.mxu1 %v6600_v43  ;;  %v6688_v43 = vld [vmem:[%s9142_s0 + $0x5dc] ss:$72 sps:$4 sm:$0xff]  }
 0x182   :  { %3639 = vmatmul.mubr.bf16.gmra.mrb[4].mxu1 %v6603_v45  ;;  %5532 = vmatprep.subr.bf16.mxu1 %v6607_v44  ;;  %v6690_v44 = vld [vmem:[%s9142_s0 + $0x5b8] ss:$72 sps:$4 sm:$0xff]  }
 0x183   :  { %4283 = vmatmul.mubr.bf16.gmra.mrb[4].mxu0 %v6604_v46  ;;  %3648 = vmatprep.mubr.bf16.mxu1 %v6608_v48  ;;  %v6691_v45 = vld [vmem:[%s9142_s0 + $0x5d8] ss:$72 sps:$4 sm:$0xff]   ;;  %v6695_v46 = vld [vmem:[%s9142_s0 + $0x64c] ss:$72 sps:$4 sm:$0xff]  }
 0x184   :  { %4406 = vmatpush1.bf16.msra.mxu0 %v6605_v47  ;;  %4292 = vmatprep.mubr.bf16.mxu0 %v6610_v49  ;;  %v236_v48 = vld [vmem:[%s9142_s0 + $0x6d8] sm:$0x33] }
 0x185   :  { %4407 = vmatprep.subr.bf16.mxu0 %v6616_v50  ;;  %5548 = vmatpush1.bf16.msra.mxu1 %v6605_v47  ;;  %v6697_v47 = vld [vmem:[%s9142_s0 + $0x66c] ss:$72 sps:$4 sm:$0xff]   ;;  %v240_v49 = vld [vmem:[%s9142_s0 + $0x6f8] sm:$0x33] }
 0x186   :  { %5533 = vmatprep.subr.bf16.mxu1 %v6616_v50  ;;  %v6699_v50 = vld [vmem:[%s9142_s0 + $0x648] ss:$72 sps:$4 sm:$0xff]  }
 0x188   :  { %4408 = vmatpush1.bf16.msra.mxu0 %v6614_v51 }
 0x189   :  { %4409 = vmatprep.subr.bf16.mxu0 %v6625_v52  ;;  %5549 = vmatpush1.bf16.msra.mxu1 %v6614_v51  ;;  %v6700_v51 = vld [vmem:[%s9142_s0 + $0x668] ss:$72 sps:$4 sm:$0xff]  }
 0x18a   :  { %3649 = vmatmul.mubr.bf16.gmra.mrb[8].mxu1 %v6612_v53  ;;  %5534 = vmatprep.subr.bf16.mxu1 %v6625_v52  ;;  %v5231_v52 = vcombine.high %v236_v48, %v236_v48  ;;  %v5239_v53 = vcombine.high %v240_v49, %v240_v49 }
 0x18b   :  { %4293 = vmatmul.mubr.bf16.gmra.mrb[8].mxu0 %v6613_v54  ;;  %3658 = vmatprep.mubr.bf16.mxu1 %v6617_v55  ;;  %v5230_v54 = vcombine.low %v236_v48, %v236_v48  ;;  %v5238_v55 = vcombine.low %v240_v49, %v240_v49 }
 0x18c   :  { %4302 = vmatprep.mubr.bf16.mxu0 %v6619_v56  ;;  %4410 = vmatpush1.bf16.msra.mxu0 %v6623_v57  ;;  %v6713_v56 = vld [vmem:[%s9142_s0 + $0x44] ss:$72 sps:$4 sm:$0xff]  }
 0x18d   :  { %4411 = vmatprep.subr.bf16.mxu0 %v6634_v58  ;;  %5550 = vmatpush1.bf16.msra.mxu1 %v6623_v57  ;;  %v6716_v57 = vld [vmem:[%s9142_s0 + $0x434] ss:$72 sps:$4 sm:$0xff]  }
 0x18e   :  { %5535 = vmatprep.subr.bf16.mxu1 %v6634_v58  ;;  %v6711_v58 = vld [vmem:[%s9142_s0 + $0x40] ss:$72 sps:$4 sm:$0xff]  }
 0x190   :  { %4412 = vmatpush1.bf16.msra.mxu0 %v6632_v59 }
 0x191   :  { %4413 = vmatprep.subr.bf16.mxu0 %v6641_v60  ;;  %5551 = vmatpush1.bf16.msra.mxu1 %v6632_v59  ;;  %v6714_v59 = vld [vmem:[%s9142_s0 + $0x430] ss:$72 sps:$4 sm:$0xff]  }
 0x192   :  { %3659 = vmatmul.mubr.bf16.gmra.mrb[12].mxu1 %v6621_v61  ;;  %5536 = vmatprep.subr.bf16.mxu1 %v6641_v60  ;;  %v6717_v60 = vld [vmem:[%s9142_s0 + $0xd4] ss:$72 sps:$4 sm:$0xff]   ;;  %v6719_v61 = vld [vmem:[%s9142_s0 + $0x4c4] ss:$72 sps:$4 sm:$0xff]  }
 0x193   :  { %4303 = vmatmul.mubr.bf16.gmra.mrb[12].mxu0 %v6622_v62  ;;  %3668 = vmatprep.mubr.bf16.mxu1 %v6626_v63  ;;  %v6721_v62 = vld [vmem:[%s9142_s0 + $0xd0] ss:$72 sps:$4 sm:$0xff]   ;;  %v6722_v63 = vld [vmem:[%s9142_s0 + $0x4c0] ss:$72 sps:$4 sm:$0xff]  }
 0x194   :  { %4312 = vmatprep.mubr.bf16.mxu0 %v6628_v0  ;;  %4414 = vmatpush1.bf16.msra.mxu0 %v6639_v1  ;;  %v6723_v0 = vld [vmem:[%s9142_s0 + $0x164] ss:$72 sps:$4 sm:$0xff]  }
 0x195   :  { %4415 = vmatprep.subr.bf16.mxu0 %v6646_v2  ;;  %5552 = vmatpush1.bf16.msra.mxu1 %v6639_v1  ;;  %v6725_v1 = vld [vmem:[%s9142_s0 + $0x554] ss:$72 sps:$4 sm:$0xff]  }
 0x196   :  { %5537 = vmatprep.subr.bf16.mxu1 %v6646_v2  ;;  %v6727_v2 = vld [vmem:[%s9142_s0 + $0x160] ss:$72 sps:$4 sm:$0xff]  }
 0x198   :  { %4416 = vmatpush1.bf16.msra.mxu0 %v6644_v3 }
 0x199   :  { %4417 = vmatprep.subr.bf16.mxu0 %v6655_v4  ;;  %5553 = vmatpush1.bf16.msra.mxu1 %v6644_v3  ;;  %v6728_v3 = vld [vmem:[%s9142_s0 + $0x550] ss:$72 sps:$4 sm:$0xff]  }
 0x19a   :  { %3669 = vmatmul.mubr.bf16.gmra.mrb[16].mxu1 %v6630_v5  ;;  %5538 = vmatprep.subr.bf16.mxu1 %v6655_v4  ;;  %v6729_v4 = vld [vmem:[%s9142_s0 + $0x1f4] ss:$72 sps:$4 sm:$0xff]   ;;  %v6731_v5 = vld [vmem:[%s9142_s0 + $0x5e4] ss:$72 sps:$4 sm:$0xff]  }
 0x19b   :  { %4313 = vmatmul.mubr.bf16.gmra.mrb[16].mxu0 %v6631_v6  ;;  %3678 = vmatprep.mubr.bf16.mxu1 %v6635_v7  ;;  %v6733_v6 = vld [vmem:[%s9142_s0 + $0x1f0] ss:$72 sps:$4 sm:$0xff]   ;;  %v6734_v7 = vld [vmem:[%s9142_s0 + $0x5e0] ss:$72 sps:$4 sm:$0xff]  }
 0x19c   :  { %4322 = vmatprep.mubr.bf16.mxu0 %v6637_v8  ;;  %4418 = vmatpush1.bf16.msra.mxu0 %v6653_v9  ;;  %v6735_v8 = vld [vmem:[%s9142_s0 + $0x284] ss:$72 sps:$4 sm:$0xff]  }
 0x19d   :  { %4419 = vmatprep.subr.bf16.mxu0 %v6664_v10  ;;  %5554 = vmatpush1.bf16.msra.mxu1 %v6653_v9  ;;  %v6737_v9 = vld [vmem:[%s9142_s0 + $0x674] ss:$72 sps:$4 sm:$0xff]  }
 0x19e   :  { %5539 = vmatprep.subr.bf16.mxu1 %v6664_v10  ;;  %v241_v10 = vld [vmem:[%s9142_s0 + $0x700] sm:$0x33] }
 0x1a0   :  { %4420 = vmatpush1.bf16.msra.mxu0 %v6662_v11 }
 0x1a1   :  { %4421 = vmatprep.subr.bf16.mxu0 %v6673_v12  ;;  %5555 = vmatpush1.bf16.msra.mxu1 %v6662_v11  ;;  %v6739_v11 = vld [vmem:[%s9142_s0 + $0x280] ss:$72 sps:$4 sm:$0xff]  }
 0x1a2   :  { %3679 = vmatmul.mubr.bf16.gmra.mrb[20].mxu1 %v6642_v13  ;;  %5540 = vmatprep.subr.bf16.mxu1 %v6673_v12  ;;  %v6740_v12 = vld [vmem:[%s9142_s0 + $0x670] ss:$72 sps:$4 sm:$0xff]   ;;  %v6741_v13 = vld [vmem:[%s9142_s0 + $0x314] ss:$72 sps:$4 sm:$0xff]  }
 0x1a3   :  { %4323 = vmatmul.mubr.bf16.gmra.mrb[20].mxu0 %v6643_v14  ;;  %3688 = vmatprep.mubr.bf16.mxu1 %v6647_v15  ;;  %v5241_v14 = vcombine.high %v241_v10, %v241_v10  ;;  %v6744_v15 = vld [vmem:[%s9142_s0 + $0x310] ss:$72 sps:$4 sm:$0xff]  }
 0x1a4   :  { %4332 = vmatprep.mubr.bf16.mxu0 %v6649_v16  ;;  %4422 = vmatpush1.bf16.msra.mxu0 %v6671_v17  ;;  %v5240_v16 = vcombine.low %v241_v10, %v241_v10 }
 0x1a5   :  { %4423 = vmatprep.subr.bf16.mxu0 %v6682_v18  ;;  %5556 = vmatpush1.bf16.msra.mxu1 %v6671_v17  ;;  %v6746_v17 = vld [vmem:[%s9142_s0 + $0x3a4] ss:$72 sps:$4 sm:$0xff]  }
 0x1a6   :  { %5541 = vmatprep.subr.bf16.mxu1 %v6682_v18  ;;  %v6748_v18 = vld [vmem:[%s9142_s0 + $0x3a0] ss:$72 sps:$4 sm:$0xff]  }
 0x1a8   :  { %4424 = vmatpush1.bf16.msra.mxu0 %v6680_v19 }
 0x1a9   :  { %4425 = vmatprep.subr.bf16.mxu0 %v6685_v20  ;;  %5557 = vmatpush1.bf16.msra.mxu1 %v6680_v19 }
 0x1aa   :  { %3689 = vmatmul.mubr.bf16.gmra.mrb[24].mxu1 %v6651_v21  ;;  %5542 = vmatprep.subr.bf16.mxu1 %v6685_v20 }
 0x1ab   :  { %4333 = vmatmul.mubr.bf16.gmra.mrb[24].mxu0 %v6652_v22  ;;  %3698 = vmatprep.mubr.bf16.mxu1 %v6656_v23 }
 0x1ac   :  { %4342 = vmatprep.mubr.bf16.mxu0 %v6658_v24  ;;  %4426 = vmatpush1.bf16.msra.mxu0 %v6683_v25 }
 0x1ad   :  { %4427 = vmatprep.subr.bf16.mxu0 %v6694_v26  ;;  %5558 = vmatpush1.bf16.msra.mxu1 %v6683_v25 }
 0x1ae   :  { %5543 = vmatprep.subr.bf16.mxu1 %v6694_v26 }
 0x1b0   :  { %4428 = vmatpush1.bf16.msra.mxu0 %v6692_v27 }
 0x1b1   :  { %4429 = vmatprep.subr.bf16.mxu0 %v6703_v28  ;;  %5559 = vmatpush1.bf16.msra.mxu1 %v6692_v27 }
 0x1b2   :  { %3699 = vmatmul.mubr.bf16.gmra.mrb[28].mxu1 %v6660_v29  ;;  %5544 = vmatprep.subr.bf16.mxu1 %v6703_v28 }
 0x1b3   :  { %4343 = vmatmul.mubr.bf16.gmra.mrb[28].mxu0 %v6661_v30  ;;  %3708 = vmatprep.mubr.bf16.mxu1 %v6665_v31 }
 0x1b4   :  { %4352 = vmatprep.mubr.bf16.mxu0 %v6667_v32  ;;  %4430 = vmatpush1.bf16.msra.mxu0 %v6701_v33 }
 0x1b5   :  { %4431 = vmatprep.subr.bf16.mxu0 %v6710_v34  ;;  %5560 = vmatpush1.bf16.msra.mxu1 %v6701_v33 }
 0x1b6   :  { %5545 = vmatprep.subr.bf16.mxu1 %v6710_v34 }
 0x1b8   :  { %4432 = vmatpush1.bf16.msra.mxu0 %v6708_v35 }
 0x1b9   :  { %5561 = vmatpush1.bf16.msra.mxu1 %v6708_v35 }
 0x1ba   :  { %3709 = vmatmul.mubr.bf16.gmra.mrb[32].mxu1 %v6669_v36 }
 0x1bb   :  { %4353 = vmatmul.mubr.bf16.gmra.mrb[32].mxu0 %v6670_v37  ;;  %3718 = vmatprep.mubr.bf16.mxu1 %v6674_v38 }
 0x1bc   :  { %4362 = vmatprep.mubr.bf16.mxu0 %v6676_v39 }
 0x1c2   :  { %3719 = vmatmul.mubr.bf16.gmra.mrb[36].mxu1 %v6678_v40 }
 0x1c3   :  { %4363 = vmatmul.mubr.bf16.gmra.mrb[36].mxu0 %v6679_v41  ;;  %3728 = vmatprep.mubr.bf16.mxu1 %v6686_v42 }
 0x1c4   :  { %4372 = vmatprep.mubr.bf16.mxu0 %v6688_v43 }
 0x1ca   :  { %3729 = vmatmul.mubr.bf16.gmra.mrb[40].mxu1 %v6690_v44 }
 0x1cb   :  { %4373 = vmatmul.mubr.bf16.gmra.mrb[40].mxu0 %v6691_v45  ;;  %3738 = vmatprep.mubr.bf16.mxu1 %v6695_v46 }
 0x1cc   :  { %4382 = vmatprep.mubr.bf16.mxu0 %v6697_v47 }
 0x1d2   :  { %3739 = vmatmul.mubr.bf16.gmra.mrb[44].mxu1 %v6699_v50 }
 0x1d3   :  { %4383 = vmatmul.mubr.bf16.gmra.mrb[44].mxu0 %v6700_v51  ;;  %3748 = vmatprep.mubr.bf16.mxu1 %v5231_v52 }
 0x1d4   :  { %4392 = vmatprep.mubr.bf16.mxu0 %v5239_v53 }
 0x1da   :  { %3749 = vmatmul.mubr.bf16.gmra.mrb[48].mxu1 %v5230_v54 }
 0x1db   :  { %4393 = vmatmul.mubr.bf16.gmra.mrb[48].mxu0 %v5238_v55  ;;  %4503 = vmatprep.mubr.bf16.mxu1 %v6716_v57 }
 0x1dc   :  { %4433 = vmatprep.mubr.bf16.mxu0 %v6713_v56 }
 0x1e2   :  { %4504 = vmatmul.mubr.bf16.vlgmr.msra.gmra.mrb[52].mxu1 %v6714_v59 }
 0x1e3   :  { %4434 = vmatmul.mubr.bf16.vlgmr.msra.gmra.mrb[0].mxu0 %v6711_v58  ;;  %4513 = vmatprep.mubr.bf16.mxu1 %v6719_v61 }
 0x1e4   :  { %4443 = vmatprep.mubr.bf16.mxu0 %v6717_v60 }
 0x1ea   :  { %4514 = vmatmul.mubr.bf16.gmra.mrb[56].mxu1 %v6722_v63 }
 0x1eb   :  { %4444 = vmatmul.mubr.bf16.gmra.mrb[4].mxu0 %v6721_v62  ;;  %4523 = vmatprep.mubr.bf16.mxu1 %v6725_v1 }
 0x1ec   :  { %4453 = vmatprep.mubr.bf16.mxu0 %v6723_v0 }
 0x1f2   :  { %4524 = vmatmul.mubr.bf16.gmra.mrb[60].mxu1 %v6728_v3 }
 0x1f3   :  { %4454 = vmatmul.mubr.bf16.gmra.mrb[8].mxu0 %v6727_v2  ;;  %4533 = vmatprep.mubr.bf16.mxu1 %v6731_v5 }
 0x1f4   :  { %4463 = vmatprep.mubr.bf16.mxu0 %v6729_v4 }
 0x1fa   :  { %4534 = vmatmul.mubr.bf16.gmra.mrb[64].mxu1 %v6734_v7 }
 0x1fb   :  { %4464 = vmatmul.mubr.bf16.gmra.mrb[12].mxu0 %v6733_v6  ;;  %4543 = vmatprep.mubr.bf16.mxu1 %v6737_v9 }
 0x1fc   :  { %4473 = vmatprep.mubr.bf16.mxu0 %v6735_v8 }
 0x202   :  { %4544 = vmatmul.mubr.bf16.gmra.mrb[68].mxu1 %v6740_v12 }
 0x203   :  { %4474 = vmatmul.mubr.bf16.gmra.mrb[16].mxu0 %v6739_v11  ;;  %4553 = vmatprep.mubr.bf16.mxu1 %v5241_v14 }
 0x204   :  { %4483 = vmatprep.mubr.bf16.mxu0 %v6741_v13 }
 0x20a   :  { %4554 = vmatmul.mubr.bf16.gmra.mrb[72].mxu1 %v5240_v16 }
 0x20b   :  { %4484 = vmatmul.mubr.bf16.gmra.mrb[20].mxu0 %v6744_v15 }
 0x20c   :  { %4493 = vmatprep.mubr.bf16.mxu0 %v6746_v17 }
 0x213   :  { %4494 = vmatmul.mubr.bf16.gmra.mrb[24].mxu0 %v6748_v18 }
 0x24d   :  { %v8318_v19 = vpop.f32.mrb[0].mxu1 }
 0x24e   :  { %v8320_v20 = vpop.f32.mrb[1].mxu1 }
 0x24f   :  { %v8322_v21 = vpop.f32.mrb[2].mxu1 }
 0x250   :  { %v8324_v22 = vpop.f32.mrb[3].mxu1 }
 0x255   :  { %v8326_v23 = vpop.f32.mrb[4].mxu1 }
 0x256   :  { %v8328_v24 = vpop.f32.mrb[5].mxu1 }
 0x257   :  { %v8330_v25 = vpop.f32.mrb[6].mxu1 }
 0x258   :  { %v8332_v26 = vpop.f32.mrb[7].mxu1 }
 0x25d   :  { %v8334_v27 = vpop.f32.mrb[8].mxu1 }
 0x25e   :  { %v8336_v28 = vpop.f32.mrb[9].mxu1 }
 0x25f   :  { %v8338_v29 = vpop.f32.mrb[10].mxu1 }
 0x260   :  { %v8340_v30 = vpop.f32.mrb[11].mxu1 }
 0x265   :  { %v8342_v31 = vpop.f32.mrb[12].mxu1 }
 0x266   :  { %v8344_v32 = vpop.f32.mrb[13].mxu1 }
 0x267   :  { %v8346_v33 = vpop.f32.mrb[14].mxu1 }
 0x268   :  { %v8348_v34 = vpop.f32.mrb[15].mxu1 }
 0x26d   :  { %v8350_v35 = vpop.f32.mrb[16].mxu1 }
 0x26e   :  { %v8352_v36 = vpop.f32.mrb[17].mxu1 }
 0x26f   :  { %v8354_v37 = vpop.f32.mrb[18].mxu1 }
 0x270   :  { %v8356_v38 = vpop.f32.mrb[19].mxu1 }
 0x275   :  { %v8358_v39 = vpop.f32.mrb[20].mxu1 }
 0x276   :  { %v8360_v40 = vpop.f32.mrb[21].mxu1 }
 0x277   :  { %v8362_v41 = vpop.f32.mrb[22].mxu1 }
 0x278   :  { %v8364_v42 = vpop.f32.mrb[23].mxu1 }
 0x27d   :  { %v8366_v43 = vpop.f32.mrb[24].mxu1 }
 0x27e   :  { %v8368_v44 = vpop.f32.mrb[25].mxu1 }
 0x27f   :  { %v8370_v45 = vpop.f32.mrb[26].mxu1 }
 0x280   :  { %v8372_v46 = vpop.f32.mrb[27].mxu1 }
 0x285   :  { %v3700_v47 = vpop.f32.mrb[28].mxu1 }
 0x286   :  { %v4344_v48 = vpop.f32.mrb[28].mxu0  ;;  %v3702_v50 = vpop.f32.mrb[29].mxu1 }
 0x287   :  { %v8374_v49 = vadd.f32 %v4344_v48, %v3700_v47  ;;  %v4346_v51 = vpop.f32.mrb[29].mxu0  ;;  %v3704_v53 = vpop.f32.mrb[30].mxu1 }
 0x288   :  { %v8376_v52 = vadd.f32 %v4346_v51, %v3702_v50  ;;  %v4348_v54 = vpop.f32.mrb[30].mxu0  ;;  %v3706_v56 = vpop.f32.mrb[31].mxu1 }
 0x289   :  { %v8378_v55 = vadd.f32 %v4348_v54, %v3704_v53  ;;  %v4350_v57 = vpop.f32.mrb[31].mxu0 }
 0x28a   :  { %v8380_v58 = vadd.f32 %v4350_v57, %v3706_v56 }
 0x28d   :  { %v3710_v59 = vpop.f32.mrb[32].mxu1 }
 0x28e   :  { %v4354_v60 = vpop.f32.mrb[32].mxu0  ;;  %v3712_v62 = vpop.f32.mrb[33].mxu1 }
 0x28f   :  { %v8382_v61 = vadd.f32 %v4354_v60, %v3710_v59  ;;  %v4356_v63 = vpop.f32.mrb[33].mxu0  ;;  %v3714_v1 = vpop.f32.mrb[34].mxu1 }
 0x290   :  { %v8384_v0 = vadd.f32 %v4356_v63, %v3712_v62  ;;  %v4358_v2 = vpop.f32.mrb[34].mxu0  ;;  %v3716_v4 = vpop.f32.mrb[35].mxu1 }
 0x291   :  { %v8386_v3 = vadd.f32 %v4358_v2, %v3714_v1  ;;  %v4360_v5 = vpop.f32.mrb[35].mxu0 }
 0x292   :  { %v8388_v6 = vadd.f32 %v4360_v5, %v3716_v4 }
 0x295   :  { %v3720_v7 = vpop.f32.mrb[36].mxu1 }
 0x296   :  { %v4364_v8 = vpop.f32.mrb[36].mxu0  ;;  %v3722_v10 = vpop.f32.mrb[37].mxu1 }
 0x297   :  { %v8390_v9 = vadd.f32 %v4364_v8, %v3720_v7  ;;  %v4366_v11 = vpop.f32.mrb[37].mxu0  ;;  %v3724_v13 = vpop.f32.mrb[38].mxu1 }
 0x298   :  { %v8392_v12 = vadd.f32 %v4366_v11, %v3722_v10  ;;  %v4368_v14 = vpop.f32.mrb[38].mxu0  ;;  %v3726_v16 = vpop.f32.mrb[39].mxu1 }
 0x299   :  { %v8394_v15 = vadd.f32 %v4368_v14, %v3724_v13  ;;  %v4370_v17 = vpop.f32.mrb[39].mxu0 }
 0x29a   :  { %v8396_v18 = vadd.f32 %v4370_v17, %v3726_v16 }
 0x29d   :  { %v3730_v47 = vpop.f32.mrb[40].mxu1 }
 0x29e   :  { %v4374_v48 = vpop.f32.mrb[40].mxu0  ;;  %v3732_v51 = vpop.f32.mrb[41].mxu1 }
 0x29f   :  { %v8398_v50 = vadd.f32 %v4374_v48, %v3730_v47  ;;  %v4376_v53 = vpop.f32.mrb[41].mxu0  ;;  %v3734_v56 = vpop.f32.mrb[42].mxu1 }
 0x2a0   :  { %v8400_v54 = vadd.f32 %v4376_v53, %v3732_v51  ;;  %v4378_v57 = vpop.f32.mrb[42].mxu0  ;;  %v3736_v60 = vpop.f32.mrb[43].mxu1 }
 0x2a1   :  { %v8402_v59 = vadd.f32 %v4378_v57, %v3734_v56  ;;  %v4380_v62 = vpop.f32.mrb[43].mxu0 }
 0x2a2   :  { %v8404_v63 = vadd.f32 %v4380_v62, %v3736_v60 }
 0x2a5   :  { %v3740_v1 = vpop.f32.mrb[44].mxu1 }
 0x2a6   :  { %v4384_v2 = vpop.f32.mrb[44].mxu0  ;;  %v3742_v5 = vpop.f32.mrb[45].mxu1 }
 0x2a7   :  { %v8406_v4 = vadd.f32 %v4384_v2, %v3740_v1  ;;  %v4386_v7 = vpop.f32.mrb[45].mxu0  ;;  %v3744_v10 = vpop.f32.mrb[46].mxu1 }
 0x2a8   :  { %v8408_v8 = vadd.f32 %v4386_v7, %v3742_v5  ;;  %v4388_v11 = vpop.f32.mrb[46].mxu0  ;;  %v3746_v14 = vpop.f32.mrb[47].mxu1 }
 0x2a9   :  { %v8410_v13 = vadd.f32 %v4388_v11, %v3744_v10  ;;  %v4390_v16 = vpop.f32.mrb[47].mxu0 }
 0x2aa   :  { %v8412_v17 = vadd.f32 %v4390_v16, %v3746_v14 }
 0x2ad   :  { %v3750_v47 = vpop.f32.mrb[48].mxu1 }
 0x2ae   :  { %v4394_v48 = vpop.f32.mrb[48].mxu0  ;;  %v3752_v53 = vpop.f32.mrb[49].mxu1 }
 0x2af   :  { %v8414_v51 = vadd.f32 %v4394_v48, %v3750_v47  ;;  %v4396_v56 = vpop.f32.mrb[49].mxu0  ;;  %v3754_v60 = vpop.f32.mrb[50].mxu1 }
 0x2b0   :  { %v8416_v57 = vadd.f32 %v4396_v56, %v3752_v53  ;;  %v4398_v62 = vpop.f32.mrb[50].mxu0  ;;  %v3755_v1 = vpop.f32.mrb[51].mxu1 }
 0x2b1   :  { %v4399_v2 = vpop.f32.mrb[51].mxu0 }
 0x2b5   :  { %v4505_v7 = vpop.f32.mrb[52].mxu1 }
 0x2b6   :  { %v4435_v5 = vpop.f32.mrb[0].mxu0  ;;  %v8422_v11 = vadd.f32 %v8374_v49, %v4505_v7  ;;  %v4507_v16 = vpop.f32.mrb[53].mxu1 }
 0x2b7   :  { %v8419_v10 = vadd.f32 %v4435_v5, %v8318_v19  ;;  %v4437_v14 = vpop.f32.mrb[1].mxu0  ;;  %v8428_v48 = vadd.f32 %v8376_v52, %v4507_v16  ;;  %v4509_v56 = vpop.f32.mrb[54].mxu1 }
 0x2b8   :  { %v8425_v47 = vadd.f32 %v4437_v14, %v8320_v20  ;;  %v4439_v53 = vpop.f32.mrb[2].mxu0  ;;  %v8434_v62 = vadd.f32 %v8378_v55, %v4509_v56  ;;  %v4511_v1 = vpop.f32.mrb[55].mxu1 }
 0x2b9   :  { %9163 = vst [vmem:[#allocation2_spill] sm:$0xff] %v8419_v10  ;;  %9165 = vst [vmem:[#allocation4_spill] sm:$0xff] %v8428_v48  ;;  %v8431_v60 = vadd.f32 %v4439_v53, %v8322_v21  ;;  %v4441_v19 = vpop.f32.mrb[3].mxu0  ;;  %v8440_v2 = vadd.f32 %v8380_v58, %v4511_v1 }
 0x2ba   :  { %9164 = vst [vmem:[#allocation3_spill] sm:$0xff] %v8425_v47  ;;  %v8437_v49 = vadd.f32 %v4441_v19, %v8324_v22 }
 0x2bb   :  { %9166 = vst [vmem:[#allocation5_spill] sm:$0xff] %v8431_v60  ;;  %9168 = vst [vmem:[#allocation7_spill] sm:$0xff] %v8440_v2 }
 0x2bc   :  { %9167 = vst [vmem:[#allocation6_spill] sm:$0xff] %v8437_v49 }
 0x2bd   :  { %v4515_v5 = vpop.f32.mrb[56].mxu1 }
 0x2be   :  { %v4445_v20 = vpop.f32.mrb[4].mxu0  ;;  %v8446_v7 = vadd.f32 %v8382_v61, %v4515_v5  ;;  %v4517_v14 = vpop.f32.mrb[57].mxu1 }
 0x2bf   :  { %v8443_v52 = vadd.f32 %v4445_v20, %v8326_v23  ;;  %v4447_v21 = vpop.f32.mrb[5].mxu0  ;;  %v8452_v16 = vadd.f32 %v8384_v0, %v4517_v14  ;;  %v4519_v53 = vpop.f32.mrb[58].mxu1  ;;  %v4627_v0 = vmul.f32 %v8431_v60, %v8431_v60 }
 0x2c0   :  { %v8449_v55 = vadd.f32 %v4447_v21, %v8328_v24  ;;  %v4449_v22 = vpop.f32.mrb[6].mxu0  ;;  %v4521_v19 = vpop.f32.mrb[59].mxu1  ;;  %v8458_v23 = vadd.f32 %v8386_v3, %v4519_v53 }
 0x2c1   :  { %9169 = vst [vmem:[#allocation8_spill] sm:$0xff] %v8452_v16  ;;  %v8455_v58 = vadd.f32 %v4449_v22, %v8330_v25  ;;  %v4451_v56 = vpop.f32.mrb[7].mxu0  ;;  %v8464_v1 = vadd.f32 %v8388_v6, %v4521_v19 }
 0x2c2   :  { %v8461_v61 = vadd.f32 %v4451_v56, %v8332_v26  ;;  %v4628_v26 = vmul.f32 %v8437_v49, %v8437_v49  ;;  %v4629_v56 = vmul.f32 %v8443_v52, %v8443_v52 }
 0x2c3   :  { %9171 = vst [vmem:[#allocation10_spill] sm:$0xff] %v8464_v1 }
 0x2c4   :  { %9170 = vst [vmem:[#allocation9_spill] sm:$0xff] %v8461_v61 }
 0x2c5   :  { %v4525_v20 = vpop.f32.mrb[60].mxu1 }
 0x2c6   :  { %v4455_v24 = vpop.f32.mrb[8].mxu0  ;;  %v8472_v25 = vadd.f32 %v8390_v9, %v4525_v20  ;;  %v4527_v3 = vpop.f32.mrb[61].mxu1  ;;  %v4562_v9 = vadd.f32 %v8431_v60, %v8419_v10  ;;  %v4594_v20 = vadd.f32 %v8437_v49, %v8425_v47  ;;  %v4631_v49 = vmul.f32 %v8455_v58, %v8455_v58 }
 0x2c7   :  { %v8469_v5 = vadd.f32 %v4455_v24, %v8334_v27  ;;  %v4457_v21 = vpop.f32.mrb[9].mxu0  ;;  %v8480_v6 = vadd.f32 %v8392_v12, %v4527_v3  ;;  %v4529_v53 = vpop.f32.mrb[62].mxu1  ;;  %v4625_v27 = vmul.f32 %v8419_v10, %v8419_v10  ;;  %v4626_v12 = vmul.f32 %v8425_v47, %v8425_v47 }
 0x2c8   :  { %9172 = vst [vmem:[#allocation11_spill] sm:$0xff] %v8472_v25  ;;  %v8477_v14 = vadd.f32 %v4457_v21, %v8336_v28  ;;  %v4459_v22 = vpop.f32.mrb[10].mxu0  ;;  %v4531_v28 = vpop.f32.mrb[63].mxu1  ;;  %v4630_v21 = vmul.f32 %v8449_v55, %v8449_v55  ;;  %v8498_v3 = vadd.f32 %v8394_v15, %v4529_v53  ;;  %v4563_v10 = vadd.f32 %v8443_v52, %v4562_v9 }
 0x2c9   :  { %9173 = vst [vmem:[#allocation12_spill] sm:$0xff] %v8480_v6  ;;  %v8489_v19 = vadd.f32 %v4459_v22, %v8338_v29  ;;  %v4461_v24 = vpop.f32.mrb[11].mxu0  ;;  %v4675_v60 = vadd.f32 %v4627_v0, %v4625_v27  ;;  %v4706_v22 = vadd.f32 %v4628_v26, %v4626_v12  ;;  %v4595_v6 = vadd.f32 %v8449_v55, %v4594_v20 }
 0x2ca   :  { %v8502_v29 = vadd.f32 %v4461_v24, %v8340_v30  ;;  %v8506_v25 = vadd.f32 %v8396_v18, %v4531_v28  ;;  %v4632_v15 = vmul.f32 %v8461_v61, %v8461_v61  ;;  %v4564_v27 = vadd.f32 %v8455_v58, %v4563_v10 }
 0x2cb   :  { %v4676_v1 = vadd.f32 %v4675_v60, %v4629_v56  ;;  %v4707_v47 = vadd.f32 %v4706_v22, %v4630_v21  ;;  %v4633_v30 = vmul.f32 %v8469_v5, %v8469_v5  ;;  %v4596_v56 = vadd.f32 %v8461_v61, %v4595_v6 }
 0x2cc   :  { %9174 = vst [vmem:[#allocation13_spill] sm:$0xff] %v8506_v25  ;;  %v4634_v24 = vmul.f32 %v8477_v14, %v8477_v14  ;;  %v4565_v21 = vadd.f32 %v8469_v5, %v4564_v27 }
 0x2cd   :  { %v4535_v53 = vpop.f32.mrb[64].mxu1  ;;  %v4708_v6 = vadd.f32 %v4707_v47, %v4632_v15 }
 0x2ce   :  { %v4465_v0 = vpop.f32.mrb[12].mxu0  ;;  %v8519_v18 = vadd.f32 %v8398_v50, %v4535_v53  ;;  %v4537_v9 = vpop.f32.mrb[65].mxu1  ;;  %v4597_v53 = vadd.f32 %v8477_v14, %v4596_v56  ;;  %v4566_v47 = vadd.f32 %v8489_v19, %v4565_v21 }
 0x2cf   :  { %v8516_v26 = vadd.f32 %v4465_v0, %v8342_v31  ;;  %v4467_v60 = vpop.f32.mrb[13].mxu0  ;;  %v8528_v10 = vadd.f32 %v8400_v54, %v4537_v9  ;;  %v4539_v20 = vpop.f32.mrb[66].mxu1  ;;  %v4677_v31 = vadd.f32 %v4676_v1, %v4631_v49  ;;  %v4635_v54 = vmul.f32 %v8489_v19, %v8489_v19 }
 0x2d0   :  { %v8525_v28 = vadd.f32 %v4467_v60, %v8344_v32  ;;  %v4469_v12 = vpop.f32.mrb[14].mxu0  ;;  %v4541_v0 = vpop.f32.mrb[67].mxu1  ;;  %v8536_v61 = vadd.f32 %v8402_v59, %v4539_v20  ;;  %v4709_v49 = vadd.f32 %v4708_v6, %v4634_v24  ;;  %v4598_v15 = vadd.f32 %v8502_v29, %v4597_v53 }
 0x2d1   :  { %v8532_v50 = vadd.f32 %v4469_v12, %v8346_v33  ;;  %v4471_v22 = vpop.f32.mrb[15].mxu0  ;;  %v4678_v32 = vadd.f32 %v4677_v31, %v4633_v30  ;;  %v4636_v33 = vmul.f32 %v8502_v29, %v8502_v29  ;;  %v8546_v1 = vadd.f32 %v8404_v63, %v4541_v0 }
 0x2d2   :  { %v8541_v60 = vadd.f32 %v4471_v22, %v8348_v34  ;;  %v4637_v59 = vmul.f32 %v8516_v26, %v8516_v26  ;;  %v4638_v27 = vmul.f32 %v8525_v28, %v8525_v28  ;;  %v4567_v56 = vadd.f32 %v8516_v26, %v4566_v47 }
 0x2d3   :  { %v4679_v9 = vadd.f32 %v4678_v32, %v4635_v54  ;;  %v4710_v31 = vadd.f32 %v4709_v49, %v4636_v33  ;;  %v4599_v21 = vadd.f32 %v8525_v28, %v4598_v15 }
 0x2d4   :  { %v4640_v33 = vmul.f32 %v8541_v60, %v8541_v60 }
 0x2d5   :  { %v4545_v34 = vpop.f32.mrb[68].mxu1  ;;  %v4680_v32 = vadd.f32 %v4679_v9, %v4637_v59  ;;  %v4711_v49 = vadd.f32 %v4710_v31, %v4638_v27 }
 0x2d6   :  { %v4475_v30 = vpop.f32.mrb[16].mxu0  ;;  %v8559_v63 = vadd.f32 %v8406_v4, %v4545_v34  ;;  %v4547_v20 = vpop.f32.mrb[69].mxu1 }
 0x2d7   :  { %v8556_v24 = vadd.f32 %v4475_v30, %v8350_v35  ;;  %v4477_v12 = vpop.f32.mrb[17].mxu0  ;;  %v8566_v0 = vadd.f32 %v8408_v8, %v4547_v20  ;;  %v4549_v53 = vpop.f32.mrb[70].mxu1  ;;  %v4639_v35 = vmul.f32 %v8532_v50, %v8532_v50  ;;  %v4568_v8 = vadd.f32 %v8532_v50, %v4567_v56 }
 0x2d8   :  { %v8563_v22 = vadd.f32 %v4477_v12, %v8352_v36  ;;  %v4479_v6 = vpop.f32.mrb[18].mxu0  ;;  %v4551_v47 = vpop.f32.mrb[71].mxu1  ;;  %v8576_v36 = vadd.f32 %v8410_v13, %v4549_v53  ;;  %v4712_v9 = vadd.f32 %v4711_v49, %v4640_v33 }
 0x2d9   :  { %v8571_v4 = vadd.f32 %v4479_v6, %v8354_v37  ;;  %v4481_v54 = vpop.f32.mrb[19].mxu0  ;;  %v4641_v59 = vmul.f32 %v8556_v24, %v8556_v24  ;;  %v4600_v37 = vadd.f32 %v8541_v60, %v4599_v21  ;;  %v8588_v27 = vadd.f32 %v8412_v17, %v4551_v47 }
 0x2da   :  { %v8582_v15 = vadd.f32 %v4481_v54, %v8356_v38  ;;  %v4642_v30 = vmul.f32 %v8563_v22, %v8563_v22  ;;  %v4681_v34 = vadd.f32 %v4680_v32, %v4639_v35  ;;  %v4569_v13 = vadd.f32 %v8556_v24, %v4568_v8 }
 0x2db   :  { %9175 = vst [vmem:[#allocation14_spill] sm:$0xff] %v8588_v27  ;;  %v4601_v56 = vadd.f32 %v8563_v22, %v4600_v37  ;;  %v4643_v38 = vmul.f32 %v8571_v4, %v8571_v4 }
 0x2dc   :  { %v4682_v31 = vadd.f32 %v4681_v34, %v4641_v59  ;;  %v4713_v32 = vadd.f32 %v4712_v9, %v4642_v30  ;;  %v4644_v35 = vmul.f32 %v8582_v15, %v8582_v15 }
 0x2dd   :  { %v4555_v20 = vpop.f32.mrb[72].mxu1  ;;  %v4602_v37 = vadd.f32 %v8582_v15, %v4601_v56 }
 0x2de   :  { %v4485_v12 = vpop.f32.mrb[20].mxu0  ;;  %v8598_v6 = vadd.f32 %v8414_v51, %v4555_v20  ;;  %v4557_v53 = vpop.f32.mrb[73].mxu1  ;;  %v4683_v34 = vadd.f32 %v4682_v31, %v4643_v38 }
 0x2df   :  { %v8595_v21 = vadd.f32 %v4485_v12, %v8358_v39  ;;  %v4487_v17 = vpop.f32.mrb[21].mxu0  ;;  %v8606_v47 = vadd.f32 %v8416_v57, %v4557_v53  ;;  %v4559_v33 = vpop.f32.mrb[74].mxu1  ;;  %v4570_v39 = vadd.f32 %v8571_v4, %v4569_v13  ;;  %v4714_v13 = vadd.f32 %v4713_v32, %v4644_v35 }
 0x2e0   :  { %v8603_v54 = vadd.f32 %v4487_v17, %v8360_v40  ;;  %v4489_v49 = vpop.f32.mrb[22].mxu0  ;;  %v4560_v59 = vpop.f32.mrb[75].mxu1 }
 0x2e1   :  { %9176 = vst [vmem:[#allocation15_spill] sm:$0xff] %v8606_v47  ;;  %v4645_v51 = vmul.f32 %v8595_v21, %v8595_v21  ;;  %v4491_v8 = vpop.f32.mrb[23].mxu0  ;;  %v4571_v40 = vadd.f32 %v8595_v21, %v4570_v39  ;;  %v8616_v57 = vadd.f32 %v4489_v49, %v8362_v41 }
 0x2e2   :  { %v4646_v30 = vmul.f32 %v8603_v54, %v8603_v54  ;;  %v8619_v9 = vadd.f32 %v4491_v8, %v8364_v42  ;;  %v4603_v12 = vadd.f32 %v8603_v54, %v4602_v37 }
 0x2e3   :  { %v4684_v20 = vadd.f32 %v4683_v34, %v4645_v51  ;;  %v4647_v17 = vmul.f32 %v8616_v57, %v8616_v57  ;;  %v4572_v38 = vadd.f32 %v8616_v57, %v4571_v40 }
 0x2e4   :  { %v4715_v56 = vadd.f32 %v4714_v13, %v4646_v30  ;;  %v4648_v53 = vmul.f32 %v8619_v9, %v8619_v9  ;;  %v4604_v42 = vadd.f32 %v8619_v9, %v4603_v12 }
 0x2e5   :  { %v4685_v33 = vadd.f32 %v4684_v20, %v4647_v17  ;;  %v4653_v17 = vmul.f32 %v8422_v11, %v8422_v11 }
 0x2e6   :  { %v4495_v31 = vpop.f32.mrb[24].mxu0  ;;  %v4716_v37 = vadd.f32 %v4715_v56, %v4648_v53 }
 0x2e7   :  { %v8628_v41 = vadd.f32 %v4495_v31, %v8366_v43  ;;  %v4497_v49 = vpop.f32.mrb[25].mxu0 }
 0x2e8   :  { %v8632_v32 = vadd.f32 %v4497_v49, %v8368_v44  ;;  %v4499_v35 = vpop.f32.mrb[26].mxu0  ;;  %v4655_v49 = vmul.f32 %v8434_v62, %v8434_v62 }
 0x2e9   :  { %v4573_v39 = vadd.f32 %v8628_v41, %v4572_v38  ;;  %v4649_v51 = vmul.f32 %v8628_v41, %v8628_v41  ;;  %v8638_v8 = vadd.f32 %v4499_v35, %v8370_v45  ;;  %v4501_v59 = vpop.f32.mrb[27].mxu0 }
 0x2ea   :  { %v4605_v43 = vadd.f32 %v8632_v32, %v4604_v42  ;;  %v4650_v30 = vmul.f32 %v8632_v32, %v8632_v32  ;;  %v8644_v44 = vadd.f32 %v4501_v59, %v8372_v46  ;;  %v4654_v46 = vmul.f32 %v8428_v48, %v8428_v48 }
 0x2eb   :  { %v4686_v34 = vadd.f32 %v4685_v33, %v4649_v51  ;;  %v4574_v40 = vadd.f32 %v8638_v8, %v4573_v39  ;;  %v4651_v13 = vmul.f32 %v8638_v8, %v8638_v8  ;;  %v4656_v33 = vmul.f32 %v8440_v2, %v8440_v2 }
 0x2ec   :  { %9177 = vst [vmem:[#allocation16_spill] sm:$0xff] %v8644_v44  ;;  %v4717_v12 = vadd.f32 %v4716_v37, %v4650_v30  ;;  %v4606_v45 = vadd.f32 %v8644_v44, %v4605_v43  ;;  %v4652_v20 = vmul.f32 %v8644_v44, %v8644_v44  ;;  %v4657_v59 = vmul.f32 %v8446_v7, %v8446_v7 }
 0x2ed   :  { %v4575_v56 = vadd.f32 %v8422_v11, %v4574_v40  ;;  %v4687_v53 = vadd.f32 %v4686_v34, %v4651_v13  ;;  %v4658_v30 = vmul.f32 %v8452_v16, %v8452_v16  ;;  %v4659_v13 = vmul.f32 %v8458_v23, %v8458_v23 }
 0x2ee   :  { %v4607_v31 = vadd.f32 %v8428_v48, %v4606_v45  ;;  %v4718_v38 = vadd.f32 %v4717_v12, %v4652_v20  ;;  %v9178_v20 = vld [vmem:[#allocation10_spill] sm:$0xff] }
 0x2ef   :  { %v4576_v42 = vadd.f32 %v8434_v62, %v4575_v56  ;;  %v4688_v35 = vadd.f32 %v4687_v53, %v4653_v17  ;;  %v4660_v17 = vmul.f32 %v9178_v20, %v9178_v20 }
 0x2f0   :  { %v4608_v39 = vadd.f32 %v8440_v2, %v4607_v31  ;;  %v4719_v51 = vadd.f32 %v4718_v38, %v4654_v46  ;;  %v9179_v46 = vld [vmem:[#allocation11_spill] sm:$0xff] }
 0x2f1   :  { %v4577_v37 = vadd.f32 %v8446_v7, %v4576_v42  ;;  %v4689_v43 = vadd.f32 %v4688_v35, %v4655_v49  ;;  %v4661_v31 = vmul.f32 %v9179_v46, %v9179_v46  ;;  %v9180_v42 = vld [vmem:[#allocation12_spill] sm:$0xff] }
 0x2f2   :  { %v4609_v34 = vadd.f32 %v8452_v16, %v4608_v39  ;;  %v4720_v40 = vadd.f32 %v4719_v51, %v4656_v33  ;;  %v4662_v35 = vmul.f32 %v9180_v42, %v9180_v42  ;;  %v4663_v51 = vmul.f32 %v8498_v3, %v8498_v3 }
 0x2f3   :  { %v4578_v12 = vadd.f32 %v8458_v23, %v4577_v37  ;;  %v4690_v45 = vadd.f32 %v4689_v43, %v4657_v59  ;;  %v4664_v43 = vmul.f32 %v8506_v25, %v8506_v25 }
 0x2f4   :  { %v4610_v56 = vadd.f32 %v9178_v20, %v4609_v34  ;;  %v4721_v53 = vadd.f32 %v4720_v40, %v4658_v30  ;;  %v4665_v40 = vmul.f32 %v8519_v18, %v8519_v18 }
 0x2f5   :  { %v4579_v38 = vadd.f32 %v9179_v46, %v4578_v12  ;;  %v4691_v49 = vadd.f32 %v4690_v45, %v4659_v13  ;;  %v4666_v45 = vmul.f32 %v8528_v10, %v8528_v10 }
 0x2f6   :  { %v4611_v33 = vadd.f32 %v9180_v42, %v4610_v56  ;;  %v4722_v39 = vadd.f32 %v4721_v53, %v4660_v17  ;;  %v4667_v53 = vmul.f32 %v8536_v61, %v8536_v61 }
 0x2f7   :  { %v4580_v59 = vadd.f32 %v8498_v3, %v4579_v38  ;;  %v4692_v37 = vadd.f32 %v4691_v49, %v4661_v31  ;;  %v4668_v49 = vmul.f32 %v8546_v1, %v8546_v1 }
 0x2f8   :  { %v4612_v30 = vadd.f32 %v8506_v25, %v4611_v33  ;;  %v4723_v34 = vadd.f32 %v4722_v39, %v4662_v35  ;;  %v4669_v39 = vmul.f32 %v8559_v63, %v8559_v63 }
 0x2f9   :  { %v4581_v13 = vadd.f32 %v8519_v18, %v4580_v59  ;;  %v4693_v12 = vadd.f32 %v4692_v37, %v4663_v51  ;;  %v4670_v37 = vmul.f32 %v8566_v0, %v8566_v0 }
 0x2fa   :  { %v4613_v17 = vadd.f32 %v8528_v10, %v4612_v30  ;;  %v4724_v56 = vadd.f32 %v4723_v34, %v4664_v43  ;;  %v4673_v43 = vmul.f32 %v8598_v6, %v8598_v6 }
 0x2fb   :  { %v4582_v31 = vadd.f32 %v8536_v61, %v4581_v13  ;;  %v4694_v38 = vadd.f32 %v4693_v12, %v4665_v40  ;;  %v4671_v40 = vmul.f32 %v8576_v36, %v8576_v36  ;;  %v4674_v13 = vmul.f32 %v8606_v47, %v8606_v47 }
 0x2fc   :  { %v4614_v35 = vadd.f32 %v8546_v1, %v4613_v17  ;;  %v4725_v33 = vadd.f32 %v4724_v56, %v4666_v45  ;;  %v4672_v17 = vmul.f32 %v8588_v27, %v8588_v27  ;;  %v4586_v56 = vsel %vm4585_vm0, %v8598_v6, 0.0 }
 0x2fd   :  { %v4583_v51 = vadd.f32 %v8559_v63, %v4582_v31  ;;  %v4695_v59 = vadd.f32 %v4694_v38, %v4667_v53  ;;  %v4617_v38 = vsel %vm4585_vm0, %v8606_v47, 0.0 }
 0x2fe   :  { %v4615_v30 = vadd.f32 %v8566_v0, %v4614_v35  ;;  %v4726_v34 = vadd.f32 %v4725_v33, %v4668_v49  ;;  %v4698_v33 = vsel %vm4585_vm0, %v4673_v43, 0.0 }
 0x2ff   :  { %v4584_v12 = vadd.f32 %v8576_v36, %v4583_v51  ;;  %v4696_v45 = vadd.f32 %v4695_v59, %v4669_v39  ;;  %v4729_v39 = vsel %vm4585_vm0, %v4674_v13, 0.0 }
 0x300   :  { %v4616_v53 = vadd.f32 %v8588_v27, %v4615_v30  ;;  %v4727_v31 = vadd.f32 %v4726_v34, %v4670_v37 }
 0x301   :  { %v4587_v49 = vadd.f32 %v4586_v56, %v4584_v12  ;;  %v4697_v35 = vadd.f32 %v4696_v45, %v4671_v40 }
 0x302   :  { %v4618_v25 = vadd.f32 %v4617_v38, %v4616_v53  ;;  %v4728_v42 = vadd.f32 %v4727_v31, %v4672_v17 }
 0x303   :  { %v4588_v51 = vrot.slane %v4587_v49, 4  ;;  %v4699_v59 = vadd.f32 %v4698_v33, %v4697_v35 }
 0x304   :  { %v4619_v20 = vrot.slane %v4618_v25, 4  ;;  %v4730_v16 = vadd.f32 %v4729_v39, %v4728_v42 }
 0x305   :  { %v4589_v2 = vadd.f32 %v4588_v51, %v4587_v49  ;;  %v4700_v48 = vrot.slane %v4699_v59, 4  ;;  %v4751_v51 = vlaneseq }
 0x306   :  { %v4620_v44 = vadd.f32 %v4619_v20, %v4618_v25  ;;  %v4731_v30 = vrot.slane %v4730_v16, 4 }
 0x307   :  { %v4590_v37 = vrot.slane %v4589_v2, 2  ;;  %v4701_v34 = vadd.f32 %v4700_v48, %v4699_v59 }
 0x308   :  { %v4621_v27 = vrot.slane %v4620_v44, 2  ;;  %v4732_v47 = vadd.f32 %v4731_v30, %v4730_v16  ;;  %v8722_v30 = vshrl.u32 %v4751_v51, 7 }
 0x309   :  { %v4591_v12 = vadd.f32 %v4590_v37, %v4589_v2  ;;  %v4702_v40 = vrot.slane %v4701_v34, 2 }
 0x30a   :  { %v4622_v45 = vadd.f32 %v4621_v27, %v4620_v44  ;;  %v4733_v43 = vrot.slane %v4732_v47, 2 }
 0x30b   :  { %v4592_v56 = vrot.slane %v4591_v12, 1  ;;  %v4703_v17 = vadd.f32 %v4702_v40, %v4701_v34  ;;  %v4749_v34 = vld [vmem:[%s9143_s2] sm:$0x3] }
 0x30c   :  { %v4623_v53 = vrot.slane %v4622_v45, 1  ;;  %v4734_v13 = vadd.f32 %v4733_v43, %v4732_v47  ;;  %v8725_v47 = vsub.s32 0, %v8722_v30  ;;  %v6753_v43 = vmov 1966171168  }
 0x30d   :  { %v4593_v31 = vadd.f32 %v4592_v56, %v4591_v12  ;;  %v4704_v38 = vrot.slane %v4703_v17, 1  ;;  %v4757_v12 = vsub.s32 1, %v8722_v30  ;;  %v4770_v56 = vunpack.c.l.s4 %v6753_v43 }
 0x30e   :  { %v4624_v35 = vadd.f32 %v4623_v53, %v4622_v45  ;;  %v4735_v42 = vrot.slane %v4734_v13, 1  ;;  %v4754_v40 = vrot.slane %v4749_v34, %v8725_v47 }
 0x30f   :  { %v4705_v49 = vadd.f32 %v4704_v38, %v4703_v17  ;;  %v4737_v33 = vmul.f32 0.0051020407, %v4593_v31  ;;  %v4758_v45 = vrot.slane %v4749_v34, %v4757_v12  ;;  %v4771_v38 = vunpack.c.0.s8 %v4770_v56 }
 0x310   :  { %v4736_v25 = vadd.f32 %v4735_v42, %v4734_v13  ;;  %v4738_v20 = vmul.f32 0.0051020407, %v4624_v35 }
 0x311   :  { %v4739_v39 = vmul.f32 0.0051020407, %v4705_v49  ;;  %v4741_v48 = vmul.f32 %v4737_v33, %v4737_v33 }
 0x312   :  { %v4740_v16 = vmul.f32 0.0051020407, %v4736_v25  ;;  %v4742_v2 = vmul.f32 %v4738_v20, %v4738_v20  ;;  %v4774_v25 = vsub.s32 %v4771_v38, %v8722_v30 }
 0x313   :  { %v4743_v59 = vsub.f32 %v4739_v39, %v4741_v48  ;;  %v9181_v48 = vld [vmem:[#allocation2_spill] sm:$0xff] }
 0x314   :  { %v4744_v27 = vsub.f32 %v4740_v16, %v4742_v2  ;;  %v9182_v16 = vld [vmem:[#allocation5_spill] sm:$0xff] }
 0x315   :  { %v4745_v44 = vadd.f32 1e-05, %v4743_v59 }
 0x316   :  { %v4746_v37 = vadd.f32 1e-05, %v4744_v27 }
 0x317   :  { %6749 = vrsqrt.f32 %v4745_v44 }
 0x318   :  { %6751 = vrsqrt.f32 %v4746_v37 }
 0x321   :  { %v6750_v17 = vpop.eup %6749 }
 0x322   :  { %v6752_v53 = vpop.eup %6751  ;;  %v4761_v13 = vmul.f32 %v6750_v17, %v4754_v40  ;;  %v9187_v17 = vld [vmem:[#allocation9_spill] sm:$0xff] }
 0x323   :  { %v4762_v31 = vmul.f32 %v6752_v53, %v4758_v45  ;;  %v9185_v45 = vld [vmem:[#allocation3_spill] sm:$0xff] }
 0x324   :  { %v4764_v35 = vmul.f32 %v4761_v13, %v4737_v33  ;;  %v4788_v42 = vrot.slane %v4761_v13, %v8725_v47 }
 0x325   :  { %v4765_v49 = vmul.f32 %v4762_v31, %v4738_v20  ;;  %v4792_v39 = vrot.slane %v4762_v31, %v8725_v47 }
 0x326   :  { %v4793_v51 = vmul.f32 %v9181_v48, %v4788_v42  ;;  %v4795_v2 = vmul.f32 %v9182_v16, %v4788_v42  ;;  %v4797_v59 = vmul.f32 %v8443_v52, %v4788_v42  ;;  %v4799_v27 = vmul.f32 %v8455_v58, %v4788_v42 }
 0x327   :  { %v4801_v44 = vmul.f32 %v8469_v5, %v4788_v42  ;;  %v8743_v37 = vmul.f32 %v8489_v19, %v4788_v42  ;;  %v8746_v33 = vmul.f32 %v8628_v41, %v4788_v42  ;;  %v8749_v20 = vmul.f32 %v8638_v8, %v4788_v42 }
 0x328   :  { %v4805_v34 = vmul.f32 %v8516_v26, %v4788_v42  ;;  %v8753_v40 = vmul.f32 %v8532_v50, %v4788_v42  ;;  %v8756_v52 = vmul.f32 %v8556_v24, %v4788_v42  ;;  %v8759_v58 = vmul.f32 %v8571_v4, %v4788_v42 }
 0x329   :  { %v8762_v5 = vmul.f32 %v8519_v18, %v4788_v42  ;;  %v8765_v19 = vmul.f32 %v8536_v61, %v4788_v42  ;;  %v8768_v41 = vmul.f32 %v8559_v63, %v4788_v42  ;;  %v8771_v26 = vmul.f32 %v8576_v36, %v4788_v42 }
 0x32a   :  { %v4813_v50 = vmul.f32 %v8595_v21, %v4788_v42  ;;  %v8775_v24 = vmul.f32 %v8616_v57, %v4788_v42  ;;  %v8778_v4 = vmul.f32 %v8598_v6, %v4788_v42  ;;  %v4768_v8 = vcombine.low %v4764_v35, %v4765_v49 }
 0x32b   :  { %9183 = vst [vmem:[#allocation11_spill] sm:$0xff] %v8771_v26  ;;  %v8781_v18 = vmul.f32 %v8422_v11, %v4788_v42  ;;  %v8784_v61 = vmul.f32 %v8434_v62, %v4788_v42  ;;  %v8787_v63 = vmul.f32 %v8446_v7, %v4788_v42  ;;  %v8790_v36 = vmul.f32 %v8458_v23, %v4788_v42  ;;  %v4763_v11 = vld [vmem:[%s9144_s3] sm:$0x3] }
 0x32c   :  { %9184 = vst [vmem:[#allocation2_spill] sm:$0xff] %v8778_v4  ;;  %v8793_v21 = vmul.f32 %v9179_v46, %v4788_v42  ;;  %v8796_v57 = vmul.f32 %v8498_v3, %v4788_v42  ;;  %v4775_v6 = vrot.slane %v4768_v8, %v4774_v25  ;;  %v4794_v43 = vmul.f32 %v9185_v45, %v4792_v39  ;;  %v9186_v62 = vld [vmem:[#allocation6_spill] sm:$0xff] }
 0x32d   :  { %v4796_v56 = vmul.f32 %v9186_v62, %v4792_v39  ;;  %v4798_v7 = vmul.f32 %v8449_v55, %v4792_v39  ;;  %v4800_v23 = vmul.f32 %v9187_v17, %v4792_v39  ;;  %v4802_v53 = vmul.f32 %v8477_v14, %v4792_v39 }
 0x32e   :  { %v4782_v46 = vrot.slane %v4775_v6, %v4774_v25  ;;  %v4804_v13 = vmul.f32 %v8502_v29, %v4792_v39  ;;  %v4806_v3 = vmul.f32 %v8525_v28, %v4792_v39  ;;  %v4808_v31 = vmul.f32 %v8541_v60, %v4792_v39  ;;  %v9188_v28 = vld [vmem:[#allocation16_spill] sm:$0xff]  ;;  %v9189_v60 = vld [vmem:[#allocation14_spill] sm:$0xff] }
 0x32f   :  { %v4810_v38 = vmul.f32 %v8563_v22, %v4792_v39  ;;  %v4812_v35 = vmul.f32 %v8582_v15, %v4792_v39  ;;  %v4814_v42 = vmul.f32 %v8603_v54, %v4792_v39  ;;  %v4816_v49 = vmul.f32 %v8619_v9, %v4792_v39  ;;  %v9190_v22 = vld [vmem:[#allocation15_spill] sm:$0xff]  ;;  %v9191_v15 = vld [vmem:[#allocation4_spill] sm:$0xff] }
 0x330   :  { %v4784_v55 = vsub.f32 %v4763_v11, %v4782_v46  ;;  %v4834_v48 = vmul.f32 %v8528_v10, %v4792_v39  ;;  %v4836_v14 = vmul.f32 %v8546_v1, %v4792_v39  ;;  %v4838_v25 = vmul.f32 %v8566_v0, %v4792_v39  ;;  %v9192_v54 = vld [vmem:[#allocation7_spill] sm:$0xff]  ;;  %v9193_v1 = vld [vmem:[#allocation8_spill] sm:$0xff]  ;;  %v9194_v0 = vld [vmem:[#allocation10_spill] sm:$0xff] }
 0x331   :  { %v4818_v29 = vmul.f32 %v8632_v32, %v4792_v39  ;;  %v4820_v16 = vmul.f32 %v9188_v28, %v4792_v39  ;;  %v4840_v8 = vmul.f32 %v9189_v60, %v4792_v39  ;;  %v4842_v6 = vmul.f32 %v9190_v22, %v4792_v39  ;;  %v9195_v32 = vld [vmem:[#allocation12_spill] sm:$0xff]  ;;  %v9196_v28 = vld [vmem:[#allocation13_spill] sm:$0xff] }
 0x332   :  { %v4822_v45 = vmul.f32 %v9191_v15, %v4792_v39  ;;  %v4824_v62 = vmul.f32 %v9192_v54, %v4792_v39  ;;  %v4847_v9 = vrot.slane %v4784_v55, %v8725_v47  ;;  %v4851_v10 = vrot.slane %v4784_v55, %v4757_v12 }
 0x333   :  { %v4826_v11 = vmul.f32 %v9193_v1, %v4792_v39  ;;  %v4828_v17 = vmul.f32 %v9194_v0, %v4792_v39  ;;  %v4830_v46 = vmul.f32 %v9195_v32, %v4792_v39  ;;  %v4832_v4 = vmul.f32 %v9196_v28, %v4792_v39  ;;  %v9198_v0 = vld [vmem:[#allocation2_spill] sm:$0xff] }
 0x334   :  { %v4854_v60 = vadd.f32 %v4847_v9, %v4793_v51  ;;  %v4855_v26 = vadd.f32 %v4851_v10, %v4794_v43  ;;  %v8829_v22 = vadd.f32 %v4847_v9, %v4795_v2  ;;  %v8831_v15 = vadd.f32 %v4851_v10, %v4796_v56 }
 0x335   :  { %v8833_v54 = vadd.f32 %v4847_v9, %v4797_v59  ;;  %v8835_v47 = vadd.f32 %v4851_v10, %v4798_v7  ;;  %v8837_v30 = vadd.f32 %v4847_v9, %v4799_v27  ;;  %v8839_v12 = vadd.f32 %v4851_v10, %v4800_v23 }
 0x336   :  { %v8841_v55 = vadd.f32 %v4847_v9, %v4801_v44  ;;  %v8843_v1 = vadd.f32 %v4851_v10, %v4802_v53  ;;  %v8846_v39 = vadd.f32 %v4847_v9, %v8743_v37  ;;  %v8848_v51 = vadd.f32 %v4851_v10, %v4804_v13 }
 0x337   :  { %v8850_v2 = vadd.f32 %v4847_v9, %v4805_v34  ;;  %v8852_v43 = vadd.f32 %v4851_v10, %v4806_v3  ;;  %v8855_v59 = vadd.f32 %v4847_v9, %v8753_v40  ;;  %v8857_v27 = vadd.f32 %v4851_v10, %v4808_v31 }
 0x338   :  { %v8860_v56 = vadd.f32 %v4847_v9, %v8756_v52  ;;  %v8862_v44 = vadd.f32 %v4851_v10, %v4810_v38  ;;  %v8865_v7 = vadd.f32 %v4847_v9, %v8759_v58  ;;  %v8867_v37 = vadd.f32 %v4851_v10, %v4812_v35 }
 0x339   :  { %v8869_v23 = vadd.f32 %v4847_v9, %v4813_v50  ;;  %v8871_v34 = vadd.f32 %v4851_v10, %v4814_v42  ;;  %v8874_v53 = vadd.f32 %v4847_v9, %v8775_v24  ;;  %v8876_v40 = vadd.f32 %v4851_v10, %v4816_v49 }
 0x33a   :  { %v8879_v13 = vadd.f32 %v4847_v9, %v8746_v33  ;;  %v8881_v52 = vadd.f32 %v4851_v10, %v4818_v29  ;;  %v8884_v3 = vadd.f32 %v4847_v9, %v8749_v20  ;;  %v8886_v58 = vadd.f32 %v4851_v10, %v4820_v16 }
 0x33b   :  { %v8889_v50 = vadd.f32 %v4847_v9, %v8781_v18  ;;  %v8891_v31 = vadd.f32 %v4851_v10, %v4822_v45  ;;  %v8894_v24 = vadd.f32 %v4847_v9, %v8784_v61  ;;  %v8896_v38 = vadd.f32 %v4851_v10, %v4824_v62 }
 0x33c   :  { %v8899_v33 = vadd.f32 %v4847_v9, %v8787_v63  ;;  %v8901_v35 = vadd.f32 %v4851_v10, %v4826_v11  ;;  %v8904_v20 = vadd.f32 %v4847_v9, %v8790_v36  ;;  %v8906_v42 = vadd.f32 %v4851_v10, %v4828_v17  ;;  %v9197_v11 = vld [vmem:[#allocation11_spill] sm:$0xff] }
 0x33d   :  { %v8909_v18 = vadd.f32 %v4847_v9, %v8793_v21  ;;  %v8911_v49 = vadd.f32 %v4851_v10, %v4830_v46  ;;  %v8914_v61 = vadd.f32 %v4847_v9, %v8796_v57  ;;  %v8916_v29 = vadd.f32 %v4851_v10, %v4832_v4 }
 0x33e   :  { %v8919_v63 = vadd.f32 %v4847_v9, %v8762_v5  ;;  %v8921_v16 = vadd.f32 %v4851_v10, %v4834_v48  ;;  %v8924_v36 = vadd.f32 %v4847_v9, %v8765_v19  ;;  %v8926_v45 = vadd.f32 %v4851_v10, %v4836_v14 }
 0x33f   :  { %v8929_v21 = vadd.f32 %v4847_v9, %v8768_v41  ;;  %v8931_v62 = vadd.f32 %v4851_v10, %v4838_v25  ;;  %v8934_v57 = vadd.f32 %v4847_v9, %v9197_v11  ;;  %v8936_v4 = vadd.f32 %v4851_v10, %v4840_v8 }
 0x340   :  { %v8939_v5 = vadd.f32 %v4847_v9, %v9198_v0  ;;  %v8941_v48 = vadd.f32 %v4851_v10, %v4842_v6  ;;  %v4904_v17 = vmax.f32 %v4854_v60, 0.0  ;;  %v4905_v19 = vmax.f32 %v4855_v26, 0.0 }
 0x341   :  { %v4906_v14 = vmax.f32 %v8829_v22, 0.0  ;;  %v4907_v32 = vmax.f32 %v8831_v15, 0.0  ;;  %v4908_v41 = vmax.f32 %v8833_v54, 0.0  ;;  %v4909_v25 = vmax.f32 %v8835_v47, 0.0 }
 0x342   :  { %v4910_v46 = vmax.f32 %v8837_v30, 0.0  ;;  %v4911_v8 = vmax.f32 %v8839_v12, 0.0  ;;  %v4912_v28 = vmax.f32 %v8841_v55, 0.0  ;;  %v4913_v9 = vmax.f32 %v8843_v1, 0.0  ;;  %4954 = vst [vmem:[%s9145_s4] sm:$0xff] %v4904_v17  ;;  %4955 = vst [vmem:[%s9145_s4 + $0x8] sm:$0xff] %v4905_v19 }
 0x343   :  { %v4914_v26 = vmax.f32 %v8846_v39, 0.0  ;;  %v4915_v6 = vmax.f32 %v8848_v51, 0.0  ;;  %v4916_v10 = vmax.f32 %v8850_v2, 0.0  ;;  %v4917_v60 = vmax.f32 %v8852_v43, 0.0  ;;  %4956 = vst [vmem:[%s9145_s4 + $0x10] sm:$0xff] %v4906_v14  ;;  %4957 = vst [vmem:[%s9145_s4 + $0x18] sm:$0xff] %v4907_v32 }
 0x344   :  { %4958 = vst [vmem:[%s9145_s4 + $0x20] sm:$0xff] %v4908_v41  ;;  %4959 = vst [vmem:[%s9145_s4 + $0x28] sm:$0xff] %v4909_v25  ;;  %v4918_v22 = vmax.f32 %v8855_v59, 0.0  ;;  %v4919_v15 = vmax.f32 %v8857_v27, 0.0  ;;  %v4920_v54 = vmax.f32 %v8860_v56, 0.0  ;;  %v4921_v47 = vmax.f32 %v8862_v44, 0.0 }
 0x345   :  { %4960 = vst [vmem:[%s9145_s4 + $0x30] sm:$0xff] %v4910_v46  ;;  %4961 = vst [vmem:[%s9145_s4 + $0x38] sm:$0xff] %v4911_v8  ;;  %v4922_v30 = vmax.f32 %v8865_v7, 0.0  ;;  %v4923_v12 = vmax.f32 %v8867_v37, 0.0  ;;  %v4924_v55 = vmax.f32 %v8869_v23, 0.0  ;;  %v4925_v1 = vmax.f32 %v8871_v34, 0.0 }
 0x346   :  { %4962 = vst [vmem:[%s9145_s4 + $0x40] sm:$0xff] %v4912_v28  ;;  %4963 = vst [vmem:[%s9145_s4 + $0x48] sm:$0xff] %v4913_v9  ;;  %v4926_v39 = vmax.f32 %v8874_v53, 0.0  ;;  %v4927_v51 = vmax.f32 %v8876_v40, 0.0  ;;  %v4928_v2 = vmax.f32 %v8879_v13, 0.0  ;;  %v4929_v43 = vmax.f32 %v8881_v52, 0.0 }
 0x347   :  { %4964 = vst [vmem:[%s9145_s4 + $0x50] sm:$0xff] %v4914_v26  ;;  %4965 = vst [vmem:[%s9145_s4 + $0x58] sm:$0xff] %v4915_v6  ;;  %v4930_v59 = vmax.f32 %v8884_v3, 0.0  ;;  %v4931_v27 = vmax.f32 %v8886_v58, 0.0  ;;  %v4932_v56 = vmax.f32 %v8889_v50, 0.0  ;;  %v4933_v44 = vmax.f32 %v8891_v31, 0.0 }
 0x348   :  { %4966 = vst [vmem:[%s9145_s4 + $0x60] sm:$0xff] %v4916_v10  ;;  %4967 = vst [vmem:[%s9145_s4 + $0x68] sm:$0xff] %v4917_v60  ;;  %v4934_v7 = vmax.f32 %v8894_v24, 0.0  ;;  %v4935_v37 = vmax.f32 %v8896_v38, 0.0  ;;  %v4936_v23 = vmax.f32 %v8899_v33, 0.0  ;;  %v4937_v34 = vmax.f32 %v8901_v35, 0.0 }
 0x349   :  { %4968 = vst [vmem:[%s9145_s4 + $0x70] sm:$0xff] %v4918_v22  ;;  %4969 = vst [vmem:[%s9145_s4 + $0x78] sm:$0xff] %v4919_v15  ;;  %v4938_v53 = vmax.f32 %v8904_v20, 0.0  ;;  %v4939_v40 = vmax.f32 %v8906_v42, 0.0  ;;  %v4940_v13 = vmax.f32 %v8909_v18, 0.0  ;;  %v4941_v52 = vmax.f32 %v8911_v49, 0.0 }
 0x34a   :  { %4970 = vst [vmem:[%s9145_s4 + $0x80] sm:$0xff] %v4920_v54  ;;  %4971 = vst [vmem:[%s9145_s4 + $0x88] sm:$0xff] %v4921_v47  ;;  %v4942_v3 = vmax.f32 %v8914_v61, 0.0  ;;  %v4943_v58 = vmax.f32 %v8916_v29, 0.0  ;;  %v4944_v50 = vmax.f32 %v8919_v63, 0.0  ;;  %v4945_v31 = vmax.f32 %v8921_v16, 0.0 }
 0x34b   :  { %4972 = vst [vmem:[%s9145_s4 + $0x90] sm:$0xff] %v4922_v30  ;;  %4973 = vst [vmem:[%s9145_s4 + $0x98] sm:$0xff] %v4923_v12  ;;  %v4946_v24 = vmax.f32 %v8924_v36, 0.0  ;;  %v4947_v38 = vmax.f32 %v8926_v45, 0.0  ;;  %v4948_v33 = vmax.f32 %v8929_v21, 0.0  ;;  %v4949_v35 = vmax.f32 %v8931_v62, 0.0 }
 0x34c   :  { %4974 = vst [vmem:[%s9145_s4 + $0xa0] sm:$0xff] %v4924_v55  ;;  %4975 = vst [vmem:[%s9145_s4 + $0xa8] sm:$0xff] %v4925_v1  ;;  %v4950_v20 = vmax.f32 %v8934_v57, 0.0  ;;  %v4951_v42 = vmax.f32 %v8936_v4, 0.0  ;;  %v4952_v18 = vmax.f32 %v8939_v5, 0.0  ;;  %v4953_v49 = vmax.f32 %v8941_v48, 0.0 }
 0x34d   :  { %4976 = vst [vmem:[%s9145_s4 + $0xb0] sm:$0xff] %v4926_v39  ;;  %4977 = vst [vmem:[%s9145_s4 + $0xb8] sm:$0xff] %v4927_v51 }
 0x34e   :  { %4978 = vst [vmem:[%s9145_s4 + $0xc0] sm:$0xff] %v4928_v2  ;;  %4979 = vst [vmem:[%s9145_s4 + $0xc8] sm:$0xff] %v4929_v43 }
 0x34f   :  { %4980 = vst [vmem:[%s9145_s4 + $0xd0] sm:$0xff] %v4930_v59  ;;  %4981 = vst [vmem:[%s9145_s4 + $0xd8] sm:$0xff] %v4931_v27 }
 0x350   :  { %4982 = vst [vmem:[%s9145_s4 + $0xe0] sm:$0xff] %v4932_v56  ;;  %4983 = vst [vmem:[%s9145_s4 + $0xe8] sm:$0xff] %v4933_v44 }
 0x351   :  { %4984 = vst [vmem:[%s9145_s4 + $0xf0] sm:$0xff] %v4934_v7  ;;  %4985 = vst [vmem:[%s9145_s4 + $0xf8] sm:$0xff] %v4935_v37 }
 0x352   :  { %4986 = vst [vmem:[%s9145_s4 + $0x100] sm:$0xff] %v4936_v23  ;;  %4987 = vst [vmem:[%s9145_s4 + $0x108] sm:$0xff] %v4937_v34 }
 0x353   :  { %4988 = vst [vmem:[%s9145_s4 + $0x110] sm:$0xff] %v4938_v53  ;;  %4989 = vst [vmem:[%s9145_s4 + $0x118] sm:$0xff] %v4939_v40 }
 0x354   :  { %4990 = vst [vmem:[%s9145_s4 + $0x120] sm:$0xff] %v4940_v13  ;;  %4991 = vst [vmem:[%s9145_s4 + $0x128] sm:$0xff] %v4941_v52 }
 0x355   :  { %4992 = vst [vmem:[%s9145_s4 + $0x130] sm:$0xff] %v4942_v3  ;;  %4993 = vst [vmem:[%s9145_s4 + $0x138] sm:$0xff] %v4943_v58 }
 0x356   :  { %4994 = vst [vmem:[%s9145_s4 + $0x140] sm:$0xff] %v4944_v50  ;;  %4995 = vst [vmem:[%s9145_s4 + $0x148] sm:$0xff] %v4945_v31 }
 0x357   :  { %4996 = vst [vmem:[%s9145_s4 + $0x150] sm:$0xff] %v4946_v24  ;;  %4997 = vst [vmem:[%s9145_s4 + $0x158] sm:$0xff] %v4947_v38 }
 0x358   :  { %4998 = vst [vmem:[%s9145_s4 + $0x160] sm:$0xff] %v4948_v33  ;;  %4999 = vst [vmem:[%s9145_s4 + $0x168] sm:$0xff] %v4949_v35 }
 0x359   :  { %5000 = vst [vmem:[%s9145_s4 + $0x170] sm:$0xff] %v4950_v20  ;;  %5001 = vst [vmem:[%s9145_s4 + $0x178] sm:$0xff] %v4951_v42 }
 0x35a   :  { %5002 = vst [vmem:[%s9145_s4 + $0x180] sm:$0xf] %v4952_v18  ;;  %5003 = vst [vmem:[%s9145_s4 + $0x188] sm:$0xf] %v4953_v49 }

</bundles_post_ra>
